<compile_context>
chip_gen: v5e
topology: v5e:2x2
jax: 0.10.0
libtpu: 0.0.40
codegen_flags: <defaults>
</compile_context>

<pallas_src>
import functools

import jax
import jax.numpy as jnp
from jax import lax
from jax.experimental import pallas as pl
from jax.experimental.pallas import tpu as pltpu

IN_FEATS = 784


def _mlp_kernel(x_ref,
                w0_ref, b0_ref,
                w1_ref, b1_ref,
                w2_ref, b2_ref,
                w3_ref, b3_ref,
                w4t_ref, b4_ref,
                o_ref):
    """Whole 5-layer MLP on one (TM, 784) row tile. All weights resident in VMEM."""
    # Cast to bf16 in VMEM (x arrives as raw f32 rows; no wrapper-side pass).
    h = x_ref[...].astype(jnp.bfloat16)              # (TM, 784)

    def layer(h, w_ref, b_ref):
        acc = jnp.dot(h, w_ref[...], preferred_element_type=jnp.float32)
        acc = acc + b_ref[...]                        # bias + ReLU in f32
        return jnp.maximum(acc, 0.0).astype(jnp.bfloat16)

    h = layer(h, w0_ref, b0_ref)                      # (TM, 512)
    h = layer(h, w1_ref, b1_ref)                      # (TM, 256)
    h = layer(h, w2_ref, b2_ref)                      # (TM, 128)
    h = layer(h, w3_ref, b3_ref)                      # (TM, 64)

    # Final 64 -> 1 layer, computed transposed so the result is a lane-dense
    # (1, TM) row instead of a (TM, 1)/(TM, 128) column: contract the 64-dim
    # of both operands -> (1, TM).
    logit = lax.dot_general(
        w4t_ref[...], h,
        dimension_numbers=(((1,), (1,)), ((), ())),
        preferred_element_type=jnp.float32) + b4_ref[...]
    # sigmoid = 1 / (1 + exp(-x)); approx reciprocal keeps it on the EUP slot.
    o_ref[...] = pl.reciprocal(1.0 + jnp.exp(-logit), approx=True).astype(o_ref.dtype)


def init_discriminator_params(key):
    """Deterministic PyTorch-style (uniform +/- 1/sqrt(fan_in)) init, f32 master."""
    dims = [(784, 512), (512, 256), (256, 128), (128, 64), (64, 1)]
    params = []
    for fi, fo in dims:
        key, k_w, k_b = jax.random.split(key, 3)
        bound = 1.0 / jnp.sqrt(jnp.float32(fi))
        w = jax.random.uniform(k_w, (fi, fo), jnp.float32, -bound, bound)
        b = jax.random.uniform(k_b, (1, fo), jnp.float32, -bound, bound)
        params.append((w, b))
    return params


def _round_up(a, m):
    return ((a + m - 1) // m) * m


@functools.partial(jax.jit, static_argnames=("tm",))
def discriminator_forward(x, params, *, tm=1024):
    # glue: x.view(-1, 784). No feature padding, no wrapper-side bf16 cast.
    x2 = jnp.reshape(x, (-1, IN_FEATS)).astype(jnp.float32)
    n_rows = x2.shape[0]

    # Row-tile selection (static under jit):
    #  * small batches: one tile, rows rounded to the 8-sublane minimum.
    #  * large batches: big tiles (default 1024), but clamped so the parallel
    #    grid axis has >= 2 steps (v7x megacore sharding).
    if n_rows <= 512:
        tm_eff = max(8, _round_up(n_rows, 8))
    else:
        tm_eff = min(tm, _round_up(pl.cdiv(n_rows, 2), 8))
    n_pad = _round_up(n_rows, tm_eff)
    if n_pad != n_rows:
        x2 = jnp.pad(x2, ((0, n_pad - n_rows), (0, 0)))

    # bf16 matmul operands (f32 accumulate in kernel), f32 biases.
    # w4 is passed transposed (1, 64) so the final layer produces (1, TM).
    (w0, b0), (w1, b1), (w2, b2), (w3, b3), (w4, b4) = params
    flat_params = [w0.astype(jnp.bfloat16), b0,
                   w1.astype(jnp.bfloat16), b1,
                   w2.astype(jnp.bfloat16), b2,
                   w3.astype(jnp.bfloat16), b3,
                   w4.T.astype(jnp.bfloat16), b4]

    grid = (n_pad // tm_eff,)

    # x tile moves with the grid; weights/biases use a constant index_map so
    # they are DMA'd into VMEM once and stay resident across all grid steps.
    in_specs = [pl.BlockSpec((tm_eff, IN_FEATS), lambda i: (i, 0))]
    for arr in flat_params:
        in_specs.append(pl.BlockSpec(arr.shape, lambda i: (0, 0)))

    out = pl.pallas_call(
        _mlp_kernel,
        out_shape=jax.ShapeDtypeStruct((1, n_pad), jnp.float32),
        grid=grid,
        in_specs=in_specs,
        out_specs=pl.BlockSpec((1, tm_eff), lambda i: (0, i)),
        compiler_params=pltpu.CompilerParams(
            dimension_semantics=("parallel",)),
    )(x2, *flat_params)

    # Row i's probability lives at out[0, i]; padded rows >= n_rows discarded.
    return out[0, :n_rows][:, None]


def _reference_forward(x, params):
    h = jnp.reshape(x, (-1, IN_FEATS)).astype(jnp.float32)
    for i, (w, b) in enumerate(params):
        h = h @ w + b
        if i < len(params) - 1:
            h = jnp.maximum(h, 0.0)
    return jax.nn.sigmoid(h)


if __name__ == "__main__":
    key = jax.random.PRNGKey(0)
    k_params, k_x = jax.random.split(key)

    params = init_discriminator_params(k_params)

    # MNIST-like input: batch=2, 1x28x28 -> flattened to (2, 784) inside forward.
    x = jax.random.normal(k_x, (2, 1, 28, 28), jnp.float32)

    y = discriminator_forward(x, params)
    y = jax.block_until_ready(y)

    y_ref = _reference_forward(x, params)
    assert y.shape == (2, 1), y.shape
    # bf16 operands with f32 accumulation + approx reciprocal: loosened tolerance.
    assert jnp.allclose(y, y_ref, atol=3e-2, rtol=3e-2), (y, y_ref)

    print("KERNEL_OK")
</pallas_src>

<mosaic_0001>
module attributes {stable_mosaic.version = 11 : i64} {
  func.func @_mlp_kernel(%arg0: i32, %arg1: memref<8x784xf32, #tpu.memory_space<vmem>>, %arg2: memref<784x512xbf16, #tpu.memory_space<vmem>>, %arg3: memref<1x512xf32, #tpu.memory_space<vmem>>, %arg4: memref<512x256xbf16, #tpu.memory_space<vmem>>, %arg5: memref<1x256xf32, #tpu.memory_space<vmem>>, %arg6: memref<256x128xbf16, #tpu.memory_space<vmem>>, %arg7: memref<1x128xf32, #tpu.memory_space<vmem>>, %arg8: memref<128x64xbf16, #tpu.memory_space<vmem>>, %arg9: memref<1x64xf32, #tpu.memory_space<vmem>>, %arg10: memref<1x64xbf16, #tpu.memory_space<vmem>>, %arg11: memref<1x1xf32, #tpu.memory_space<vmem>>, %arg12: memref<1x8xf32, #tpu.memory_space<vmem>>) attributes {dimension_semantics = [#tpu.dimension_semantics<parallel>], iteration_bounds = array<i64: 1>, scalar_prefetch = 0 : i64, scratch_operands = 0 : i64, tpu.core_type = #tpu.core_type<tc>, window_params = [{transform_indices = @transform_0, window_bounds = array<i64: 8, 784>}, {pipeline_mode = #tpu.pipeline_mode<synchronous>, transform_indices = @transform_1, window_bounds = array<i64: 784, 512>}, {pipeline_mode = #tpu.pipeline_mode<synchronous>, transform_indices = @transform_2, window_bounds = array<i64: 1, 512>}, {pipeline_mode = #tpu.pipeline_mode<synchronous>, transform_indices = @transform_3, window_bounds = array<i64: 512, 256>}, {pipeline_mode = #tpu.pipeline_mode<synchronous>, transform_indices = @transform_4, window_bounds = array<i64: 1, 256>}, {pipeline_mode = #tpu.pipeline_mode<synchronous>, transform_indices = @transform_5, window_bounds = array<i64: 256, 128>}, {pipeline_mode = #tpu.pipeline_mode<synchronous>, transform_indices = @transform_6, window_bounds = array<i64: 1, 128>}, {pipeline_mode = #tpu.pipeline_mode<synchronous>, transform_indices = @transform_7, window_bounds = array<i64: 128, 64>}, {pipeline_mode = #tpu.pipeline_mode<synchronous>, transform_indices = @transform_8, window_bounds = array<i64: 1, 64>}, {pipeline_mode = #tpu.pipeline_mode<synchronous>, transform_indices = @transform_9, window_bounds = array<i64: 1, 64>}, {pipeline_mode = #tpu.pipeline_mode<synchronous>, transform_indices = @transform_10, window_bounds = array<i64: 1, 1>}, {transform_indices = @transform_11, window_bounds = array<i64: 1, 8>}]} {
    %c0 = arith.constant 0 : index
    %c0_0 = arith.constant 0 : index
    %0 = vector.load %arg1[%c0, %c0_0] : memref<8x784xf32, #tpu.memory_space<vmem>>, vector<8x784xf32>
    %1 = arith.truncf %0 : vector<8x784xf32> to vector<8x784xbf16>
    %c0_1 = arith.constant 0 : index
    %c0_2 = arith.constant 0 : index
    %2 = vector.load %arg2[%c0_1, %c0_2] : memref<784x512xbf16, #tpu.memory_space<vmem>>, vector<784x512xbf16>
    %cst = arith.constant dense<0.000000e+00> : vector<8x512xf32>
    %3 = tpu.matmul %1, %2, %cst {dimension_numbers = #tpu.dot_dimension_numbers<[1], [0], [0], [1], [0, 0, 1, 1], [], []>} : vector<8x784xbf16>, vector<784x512xbf16>, vector<8x512xf32> -> vector<8x512xf32>
    %c0_3 = arith.constant 0 : index
    %c0_4 = arith.constant 0 : index
    %4 = vector.load %arg3[%c0_3, %c0_4] : memref<1x512xf32, #tpu.memory_space<vmem>>, vector<1x512xf32>
    %5 = vector.broadcast %4 : vector<1x512xf32> to vector<8x512xf32>
    %6 = arith.addf %3, %5 : vector<8x512xf32>
    %cst_5 = arith.constant 0.000000e+00 : f32
    %7 = vector.broadcast %cst_5 : f32 to vector<8x512xf32>
    %8 = arith.maximumf %6, %7 : vector<8x512xf32>
    %9 = arith.truncf %8 : vector<8x512xf32> to vector<8x512xbf16>
    %c0_6 = arith.constant 0 : index
    %c0_7 = arith.constant 0 : index
    %10 = vector.load %arg4[%c0_6, %c0_7] : memref<512x256xbf16, #tpu.memory_space<vmem>>, vector<512x256xbf16>
    %cst_8 = arith.constant dense<0.000000e+00> : vector<8x256xf32>
    %11 = tpu.matmul %9, %10, %cst_8 {dimension_numbers = #tpu.dot_dimension_numbers<[1], [0], [0], [1], [0, 0, 1, 1], [], []>} : vector<8x512xbf16>, vector<512x256xbf16>, vector<8x256xf32> -> vector<8x256xf32>
    %c0_9 = arith.constant 0 : index
    %c0_10 = arith.constant 0 : index
    %12 = vector.load %arg5[%c0_9, %c0_10] : memref<1x256xf32, #tpu.memory_space<vmem>>, vector<1x256xf32>
    %13 = vector.broadcast %12 : vector<1x256xf32> to vector<8x256xf32>
    %14 = arith.addf %11, %13 : vector<8x256xf32>
    %cst_11 = arith.constant 0.000000e+00 : f32
    %15 = vector.broadcast %cst_11 : f32 to vector<8x256xf32>
    %16 = arith.maximumf %14, %15 : vector<8x256xf32>
    %17 = arith.truncf %16 : vector<8x256xf32> to vector<8x256xbf16>
    %c0_12 = arith.constant 0 : index
    %c0_13 = arith.constant 0 : index
    %18 = vector.load %arg6[%c0_12, %c0_13] : memref<256x128xbf16, #tpu.memory_space<vmem>>, vector<256x128xbf16>
    %cst_14 = arith.constant dense<0.000000e+00> : vector<8x128xf32>
    %19 = tpu.matmul %17, %18, %cst_14 {dimension_numbers = #tpu.dot_dimension_numbers<[1], [0], [0], [1], [0, 0, 1, 1], [], []>} : vector<8x256xbf16>, vector<256x128xbf16>, vector<8x128xf32> -> vector<8x128xf32>
    %c0_15 = arith.constant 0 : index
    %c0_16 = arith.constant 0 : index
    %20 = vector.load %arg7[%c0_15, %c0_16] : memref<1x128xf32, #tpu.memory_space<vmem>>, vector<1x128xf32>
    %21 = vector.broadcast %20 : vector<1x128xf32> to vector<8x128xf32>
    %22 = arith.addf %19, %21 : vector<8x128xf32>
    %cst_17 = arith.constant 0.000000e+00 : f32
    %23 = vector.broadcast %cst_17 : f32 to vector<8x128xf32>
    %24 = arith.maximumf %22, %23 : vector<8x128xf32>
    %25 = arith.truncf %24 : vector<8x128xf32> to vector<8x128xbf16>
    %c0_18 = arith.constant 0 : index
    %c0_19 = arith.constant 0 : index
    %26 = vector.load %arg8[%c0_18, %c0_19] : memref<128x64xbf16, #tpu.memory_space<vmem>>, vector<128x64xbf16>
    %cst_20 = arith.constant dense<0.000000e+00> : vector<8x64xf32>
    %27 = tpu.matmul %25, %26, %cst_20 {dimension_numbers = #tpu.dot_dimension_numbers<[1], [0], [0], [1], [0, 0, 1, 1], [], []>} : vector<8x128xbf16>, vector<128x64xbf16>, vector<8x64xf32> -> vector<8x64xf32>
    %c0_21 = arith.constant 0 : index
    %c0_22 = arith.constant 0 : index
    %28 = vector.load %arg9[%c0_21, %c0_22] : memref<1x64xf32, #tpu.memory_space<vmem>>, vector<1x64xf32>
    %29 = vector.broadcast %28 : vector<1x64xf32> to vector<8x64xf32>
    %30 = arith.addf %27, %29 : vector<8x64xf32>
    %cst_23 = arith.constant 0.000000e+00 : f32
    %31 = vector.broadcast %cst_23 : f32 to vector<8x64xf32>
    %32 = arith.maximumf %30, %31 : vector<8x64xf32>
    %33 = arith.truncf %32 : vector<8x64xf32> to vector<8x64xbf16>
    %c0_24 = arith.constant 0 : index
    %c0_25 = arith.constant 0 : index
    %34 = vector.load %arg10[%c0_24, %c0_25] : memref<1x64xbf16, #tpu.memory_space<vmem>>, vector<1x64xbf16>
    %cst_26 = arith.constant dense<0.000000e+00> : vector<1x8xf32>
    %35 = tpu.matmul %34, %33, %cst_26 {dimension_numbers = #tpu.dot_dimension_numbers<[1], [1], [0], [0], [0, 0, 1, 0], [], []>} : vector<1x64xbf16>, vector<8x64xbf16>, vector<1x8xf32> -> vector<1x8xf32>
    %c0_27 = arith.constant 0 : index
    %c0_28 = arith.constant 0 : index
    %36 = vector.load %arg11[%c0_27, %c0_28] : memref<1x1xf32, #tpu.memory_space<vmem>>, vector<1x1xf32>
    %37 = vector.broadcast %36 : vector<1x1xf32> to vector<1x8xf32>
    %38 = arith.addf %35, %37 : vector<1x8xf32>
    %cst_29 = arith.constant 0.000000e+00 : f32
    %39 = vector.broadcast %cst_29 : f32 to vector<1x8xf32>
    %40 = arith.subf %39, %38 : vector<1x8xf32>
    %41 = math.exp %40 : vector<1x8xf32>
    %cst_30 = arith.constant 1.000000e+00 : f32
    %42 = vector.broadcast %cst_30 : f32 to vector<1x8xf32>
    %43 = arith.addf %42, %41 : vector<1x8xf32>
    %44 = tpu.reciprocal %43 {approx = true} : vector<1x8xf32> -> vector<1x8xf32>
    %c0_31 = arith.constant 0 : index
    %c0_32 = arith.constant 0 : index
    %45 = vector.load %arg12[%c0_31, %c0_32] : memref<1x8xf32, #tpu.memory_space<vmem>>, vector<1x8xf32>
    tpu.vector_store %arg12[%c0_31, %c0_32], %44 {strides = array<i32>} : memref<1x8xf32, #tpu.memory_space<vmem>>, vector<1x8xf32>,
    return
  }
  func.func @transform_0(%arg0: i32) -> (i32, i32) {
    %c0_i32 = arith.constant 0 : i32
    %c0_i32_0 = arith.constant 0 : i32
    return %arg0, %c0_i32 : i32, i32
  }
  func.func @transform_1(%arg0: i32) -> (i32, i32) {
    %c0_i32 = arith.constant 0 : i32
    %c0_i32_0 = arith.constant 0 : i32
    %c0_i32_1 = arith.constant 0 : i32
    return %c0_i32, %c0_i32_0 : i32, i32
  }
  func.func @transform_2(%arg0: i32) -> (i32, i32) {
    %c0_i32 = arith.constant 0 : i32
    %c0_i32_0 = arith.constant 0 : i32
    %c0_i32_1 = arith.constant 0 : i32
    return %c0_i32, %c0_i32_0 : i32, i32
  }
  func.func @transform_3(%arg0: i32) -> (i32, i32) {
    %c0_i32 = arith.constant 0 : i32
    %c0_i32_0 = arith.constant 0 : i32
    %c0_i32_1 = arith.constant 0 : i32
    return %c0_i32, %c0_i32_0 : i32, i32
  }
  func.func @transform_4(%arg0: i32) -> (i32, i32) {
    %c0_i32 = arith.constant 0 : i32
    %c0_i32_0 = arith.constant 0 : i32
    %c0_i32_1 = arith.constant 0 : i32
    return %c0_i32, %c0_i32_0 : i32, i32
  }
  func.func @transform_5(%arg0: i32) -> (i32, i32) {
    %c0_i32 = arith.constant 0 : i32
    %c0_i32_0 = arith.constant 0 : i32
    %c0_i32_1 = arith.constant 0 : i32
    return %c0_i32, %c0_i32_0 : i32, i32
  }
  func.func @transform_6(%arg0: i32) -> (i32, i32) {
    %c0_i32 = arith.constant 0 : i32
    %c0_i32_0 = arith.constant 0 : i32
    %c0_i32_1 = arith.constant 0 : i32
    return %c0_i32, %c0_i32_0 : i32, i32
  }
  func.func @transform_7(%arg0: i32) -> (i32, i32) {
    %c0_i32 = arith.constant 0 : i32
    %c0_i32_0 = arith.constant 0 : i32
    %c0_i32_1 = arith.constant 0 : i32
    return %c0_i32, %c0_i32_0 : i32, i32
  }
  func.func @transform_8(%arg0: i32) -> (i32, i32) {
    %c0_i32 = arith.constant 0 : i32
    %c0_i32_0 = arith.constant 0 : i32
    %c0_i32_1 = arith.constant 0 : i32
    return %c0_i32, %c0_i32_0 : i32, i32
  }
  func.func @transform_9(%arg0: i32) -> (i32, i32) {
    %c0_i32 = arith.constant 0 : i32
    %c0_i32_0 = arith.constant 0 : i32
    %c0_i32_1 = arith.constant 0 : i32
    return %c0_i32, %c0_i32_0 : i32, i32
  }
  func.func @transform_10(%arg0: i32) -> (i32, i32) {
    %c0_i32 = arith.constant 0 : i32
    %c0_i32_0 = arith.constant 0 : i32
    %c0_i32_1 = arith.constant 0 : i32
    return %c0_i32, %c0_i32_0 : i32, i32
  }
  func.func @transform_11(%arg0: i32) -> (i32, i32) {
    %c0_i32 = arith.constant 0 : i32
    %c0_i32_0 = arith.constant 0 : i32
    return %c0_i32, %arg0 : i32, i32
  }
}

</mosaic_0001>

<bundles_post_ra>
// kernel: discriminator_forward.1
= control target key start
LH: loop header
LB: loop body
LE: loop exit
PB: predicated region body
PF: predicated region fallthrough
CT: control target
= control target key end

     0   :  { %vm1241_vm0 = vcmask 130048   ;;  %vm2366_vm1 = vcmask 523264   ;;  %vm2391_vm2 = vcmask 57344   ;;  %s5636_s1 = inlined_call_operand.vmem [shape: bf16[784,512], index: 1, kind: input, shape index: {}]   ;;  %s5637_s0 = inlined_call_operand.vmem [shape: f32[8,784], index: 0, kind: input, shape index: {}]   ;;  %s5638_s2 = inlined_call_operand.vmem [shape: f32[1,512], index: 2, kind: input, shape index: {}]   ;;  %s5639_s3 = inlined_call_operand.vmem [shape: bf16[512,256], index: 3, kind: input, shape index: {}]   ;;  %s5640_s6 = inlined_call_operand.vmem [shape: f32[1,128], index: 6, kind: input, shape index: {}]   ;;  %s5641_s4 = inlined_call_operand.vmem [shape: f32[1,256], index: 4, kind: input, shape index: {}]   ;;  %s5642_s5 = inlined_call_operand.vmem [shape: bf16[256,128], index: 5, kind: input, shape index: {}]   ;;  %s5643_s7 = inlined_call_operand.vmem [shape: bf16[128,64], index: 7, kind: input, shape index: {}]   ;;  %s5644_s8 = inlined_call_operand.vmem [shape: f32[1,64], index: 8, kind: input, shape index: {}]   ;;  %s5645_s10 = inlined_call_operand.<no memory space> [shape: f32[1,1], index: 10, kind: input, shape index: {}]   ;;  %s5646_s9 = inlined_call_operand.vmem [shape: bf16[1,64], index: 9, kind: input, shape index: {}]   ;;  %s5647_s11 = inlined_call_operand.vmem [shape: f32[1,8], index: 11, kind: output, shape index: {}]  }
   0x1   :  { %v2511_v0 = vld [vmem:[%s5636_s1 + $0xe0] sm:$0xf]  ;;  %v3568_v1 = vld [vmem:[%s5636_s1 + $0xec] sm:$0xf0] }
   0x2   :  { %v2639_v2 = vld [vmem:[%s5636_s1 + $0x1e0] sm:$0xf]  ;;  %v2512_v3 = vor.u32 %v3568_v1, %v2511_v0  ;;  %v3600_v4 = vld [vmem:[%s5636_s1 + $0x1ec] sm:$0xf0] }
   0x3   :  { %v2767_v5 = vld [vmem:[%s5636_s1 + $0x2e0] sm:$0xf]  ;;  %v3632_v6 = vld [vmem:[%s5636_s1 + $0x2ec] sm:$0xf0]  ;;  %v2640_v7 = vor.u32 %v3600_v4, %v2639_v2 }
   0x4   :  { %v2768_v8 = vor.u32 %v3632_v6, %v2767_v5  ;;  %v2895_v9 = vld [vmem:[%s5636_s1 + $0x3e0] sm:$0xf]  ;;  %v3664_v10 = vld [vmem:[%s5636_s1 + $0x3ec] sm:$0xf0]  ;;  %1245 = vmatpush.bf16.msra.mxu0 %v2512_v3 }
   0x5   :  { %v2495_v11 = vld [vmem:[%s5636_s1 + $0xc0] sm:$0xf]  ;;  %v2896_v12 = vor.u32 %v3664_v10, %v2895_v9  ;;  %v3564_v13 = vld [vmem:[%s5636_s1 + $0xcc] sm:$0xf0]  ;;  %1258 = vmatpush.bf16.msra.mxu1 %v2640_v7 }
   0x6   :  { %v2623_v14 = vld [vmem:[%s5636_s1 + $0x1c0] sm:$0xf]  ;;  %v3596_v15 = vld [vmem:[%s5636_s1 + $0x1cc] sm:$0xf0]  ;;  %1271 = vmatpush.bf16.msra.mxu2 %v2768_v8  ;;  %v2496_v16 = vor.u32 %v3564_v13, %v2495_v11 }
   0x7   :  { %v2624_v17 = vor.u32 %v3596_v15, %v2623_v14  ;;  %v2751_v18 = vld [vmem:[%s5636_s1 + $0x2c0] sm:$0xf]  ;;  %v3628_v19 = vld [vmem:[%s5636_s1 + $0x2cc] sm:$0xf0]  ;;  %1284 = vmatpush.bf16.msra.mxu3 %v2896_v12 }
   0x8   :  { %v2879_v20 = vld [vmem:[%s5636_s1 + $0x3c0] sm:$0xf]  ;;  %v2752_v21 = vor.u32 %v3628_v19, %v2751_v18  ;;  %v3660_v22 = vld [vmem:[%s5636_s1 + $0x3cc] sm:$0xf0]  ;;  %1246 = vmatpush.bf16.msra.mxu0 %v2496_v16 }
   0x9   :  { %v2479_v23 = vld [vmem:[%s5636_s1 + $0xa0] sm:$0xf]  ;;  %v3560_v24 = vld [vmem:[%s5636_s1 + $0xac] sm:$0xf0]  ;;  %v2880_v25 = vor.u32 %v3660_v22, %v2879_v20  ;;  %1259 = vmatpush.bf16.msra.mxu1 %v2624_v17 }
   0xa   :  { %v2607_v26 = vld [vmem:[%s5636_s1 + $0x1a0] sm:$0xf]  ;;  %v3592_v27 = vld [vmem:[%s5636_s1 + $0x1ac] sm:$0xf0]  ;;  %v2480_v29 = vor.u32 %v3560_v24, %v2479_v23  ;;  %1272 = vmatpush.bf16.msra.mxu2 %v2752_v21 }
   0xb   :  { %v2735_v28 = vld [vmem:[%s5636_s1 + $0x2a0] sm:$0xf]  ;;  %v3624_v30 = vld [vmem:[%s5636_s1 + $0x2ac] sm:$0xf0]  ;;  %v2608_v33 = vor.u32 %v3592_v27, %v2607_v26  ;;  %1285 = vmatpush.bf16.msra.mxu3 %v2880_v25 }
   0xc   :  { %v2863_v31 = vld [vmem:[%s5636_s1 + $0x3a0] sm:$0xf]  ;;  %v3656_v32 = vld [vmem:[%s5636_s1 + $0x3ac] sm:$0xf0]  ;;  %v2736_v34 = vor.u32 %v3624_v30, %v2735_v28  ;;  %1247 = vmatpush.bf16.msra.mxu0 %v2480_v29 }
   0xd   :  { %v2463_v35 = vld [vmem:[%s5636_s1 + $0x80] sm:$0xf]  ;;  %v3556_v36 = vld [vmem:[%s5636_s1 + $0x8c] sm:$0xf0]  ;;  %v2864_v38 = vor.u32 %v3656_v32, %v2863_v31  ;;  %1260 = vmatpush.bf16.msra.mxu1 %v2608_v33  ;;  %v3566_v33 = vld [vmem:[%s5636_s1 + $0xe4] sm:$0xf] }
   0xe   :  { %v2591_v37 = vld [vmem:[%s5636_s1 + $0x180] sm:$0xf]  ;;  %v3588_v39 = vld [vmem:[%s5636_s1 + $0x18c] sm:$0xf0]  ;;  %v2464_v44 = vor.u32 %v3556_v36, %v2463_v35  ;;  %1273 = vmatpush.bf16.msra.mxu2 %v2736_v34  ;;  %v2513_v34 = vld [vmem:[%s5636_s1 + $0xf0] sm:$0xf0] }
   0xf   :  { %v2719_v40 = vld [vmem:[%s5636_s1 + $0x280] sm:$0xf]  ;;  %v3620_v41 = vld [vmem:[%s5636_s1 + $0x28c] sm:$0xf0]  ;;  %v2592_v45 = vor.u32 %v3588_v39, %v2591_v37  ;;  %1286 = vmatpush.bf16.msra.mxu3 %v2864_v38 }
  0x10   :  { %v2847_v42 = vld [vmem:[%s5636_s1 + $0x380] sm:$0xf]  ;;  %v3652_v43 = vld [vmem:[%s5636_s1 + $0x38c] sm:$0xf0]  ;;  %v2720_v46 = vor.u32 %v3620_v41, %v2719_v40  ;;  %1248 = vmatpush.bf16.msra.mxu0 %v2464_v44  ;;  %v2641_v44 = vld [vmem:[%s5636_s1 + $0x1f0] sm:$0xf0] }
  0x11   :  { %v2447_v47 = vld [vmem:[%s5636_s1 + $0x60] sm:$0xf]  ;;  %v3552_v48 = vld [vmem:[%s5636_s1 + $0x6c] sm:$0xf0]  ;;  %v2848_v50 = vor.u32 %v3652_v43, %v2847_v42  ;;  %1261 = vmatpush.bf16.msra.mxu1 %v2592_v45  ;;  %v3598_v43 = vld [vmem:[%s5636_s1 + $0x1e4] sm:$0xf] }
  0x12   :  { %v2575_v49 = vld [vmem:[%s5636_s1 + $0x160] sm:$0xf]  ;;  %v3584_v51 = vld [vmem:[%s5636_s1 + $0x16c] sm:$0xf0]  ;;  %v2448_v56 = vor.u32 %v3552_v48, %v2447_v47  ;;  %1274 = vmatpush.bf16.msra.mxu2 %v2720_v46  ;;  %v44_v45 = vld [vmem:[%s5637_s0 + $0x18] sm:$0xff]  ;;  %v2516_v47 = vor.u32 %v3566_v33, %v2513_v34 }
  0x13   :  { %v2703_v52 = vld [vmem:[%s5636_s1 + $0x260] sm:$0xf]  ;;  %v3616_v53 = vld [vmem:[%s5636_s1 + $0x26c] sm:$0xf0]  ;;  %v2576_v57 = vor.u32 %v3584_v51, %v2575_v49  ;;  %1287 = vmatpush.bf16.msra.mxu3 %v2848_v50 }
  0x14   :  { %v2831_v54 = vld [vmem:[%s5636_s1 + $0x360] sm:$0xf]  ;;  %v3648_v55 = vld [vmem:[%s5636_s1 + $0x36c] sm:$0xf0]  ;;  %v2704_v58 = vor.u32 %v3616_v53, %v2703_v52  ;;  %1249 = vmatpush.bf16.msra.mxu0 %v2448_v56  ;;  %v3562_v53 = vld [vmem:[%s5636_s1 + $0xc4] sm:$0xf] }
  0x15   :  { %v2431_v59 = vld [vmem:[%s5636_s1 + $0x40] sm:$0xf]  ;;  %v3548_v60 = vld [vmem:[%s5636_s1 + $0x4c] sm:$0xf0]  ;;  %v2832_v62 = vor.u32 %v3648_v55, %v2831_v54  ;;  %1262 = vmatpush.bf16.msra.mxu1 %v2576_v57  ;;  %v2497_v54 = vld [vmem:[%s5636_s1 + $0xd0] sm:$0xf0]  ;;  %v4144_v57 = vpack.c.bf16 %v44_v45, %v44_v45 }
  0x16   :  { %v2559_v61 = vld [vmem:[%s5636_s1 + $0x140] sm:$0xf]  ;;  %v3580_v63 = vld [vmem:[%s5636_s1 + $0x14c] sm:$0xf0]  ;;  %v2432_v4 = vor.u32 %v3548_v60, %v2431_v59  ;;  %1275 = vmatpush.bf16.msra.mxu2 %v2704_v58  ;;  %v42_v58 = vld [vmem:[%s5637_s0 + $0x8] sm:$0xff]  ;;  %v2644_v59 = vor.u32 %v3598_v43, %v2641_v44 }
  0x17   :  { %v2687_v0 = vld [vmem:[%s5636_s1 + $0x240] sm:$0xf]  ;;  %v3612_v1 = vld [vmem:[%s5636_s1 + $0x24c] sm:$0xf0]  ;;  %v2560_v5 = vor.u32 %v3580_v63, %v2559_v61  ;;  %1288 = vmatpush.bf16.msra.mxu3 %v2832_v62  ;;  %v3594_v61 = vld [vmem:[%s5636_s1 + $0x1c4] sm:$0xf] }
  0x18   :  { %v2815_v2 = vld [vmem:[%s5636_s1 + $0x340] sm:$0xf]  ;;  %v3644_v3 = vld [vmem:[%s5636_s1 + $0x34c] sm:$0xf0]  ;;  %v2688_v6 = vor.u32 %v3612_v1, %v2687_v0  ;;  %1250 = vmatpush.bf16.msra.mxu0 %v2432_v4  ;;  %v2625_v62 = vld [vmem:[%s5636_s1 + $0x1d0] sm:$0xf0]  ;;  %v2500_v0 = vor.u32 %v3562_v53, %v2497_v54 }
  0x19   :  { %v2415_v7 = vld [vmem:[%s5636_s1 + $0x20] sm:$0xf]  ;;  %v3544_v8 = vld [vmem:[%s5636_s1 + $0x2c] sm:$0xf0]  ;;  %v2816_v10 = vor.u32 %v3644_v3, %v2815_v2  ;;  %1263 = vmatpush.bf16.msra.mxu1 %v2560_v5  ;;  %v3558_v5 = vld [vmem:[%s5636_s1 + $0xa4] sm:$0xf] }
  0x1a   :  { %v2543_v9 = vld [vmem:[%s5636_s1 + $0x120] sm:$0xf]  ;;  %v3576_v11 = vld [vmem:[%s5636_s1 + $0x12c] sm:$0xf0]  ;;  %v2416_v16 = vor.u32 %v3544_v8, %v2415_v7  ;;  %1276 = vmatpush.bf16.msra.mxu2 %v2688_v6  ;;  %v2481_v6 = vld [vmem:[%s5636_s1 + $0xb0] sm:$0xf0]  ;;  %v4175_v7 = vpack.c.bf16 %v42_v58, %v42_v58  ;;  %v2628_v8 = vor.u32 %v3594_v61, %v2625_v62 }
  0x1b   :  { %v2671_v12 = vld [vmem:[%s5636_s1 + $0x220] sm:$0xf]  ;;  %v3608_v13 = vld [vmem:[%s5636_s1 + $0x22c] sm:$0xf0]  ;;  %v2544_v20 = vor.u32 %v3576_v11, %v2543_v9  ;;  %1289 = vmatpush.bf16.msra.mxu3 %v2816_v10  ;;  %v3590_v10 = vld [vmem:[%s5636_s1 + $0x1a4] sm:$0xf] }
  0x1c   :  { %v2799_v14 = vld [vmem:[%s5636_s1 + $0x320] sm:$0xf]  ;;  %v3640_v15 = vld [vmem:[%s5636_s1 + $0x32c] sm:$0xf0]  ;;  %v2672_v21 = vor.u32 %v3608_v13, %v2671_v12  ;;  %1251 = vmatpush.bf16.msra.mxu0 %v2416_v16  ;;  %v2609_v11 = vld [vmem:[%s5636_s1 + $0x1b0] sm:$0xf0]  ;;  %v2484_v13 = vor.u32 %v3558_v5, %v2481_v6 }
  0x1d   :  { %v2399_v17 = vld [vmem:[%s5636_s1] sm:$0xf]  ;;  %v3540_v18 = vld [vmem:[%s5636_s1 + $0xc] sm:$0xf0]  ;;  %v2800_v25 = vor.u32 %v3640_v15, %v2799_v14  ;;  %1264 = vmatpush.bf16.msra.mxu1 %v2544_v20  ;;  %v2612_v20 = vor.u32 %v3590_v10, %v2609_v11  ;;  %v3546_v43 = vld [vmem:[%s5636_s1 + $0x44] sm:$0xf] }
  0x1e   :  { %v2527_v19 = vld [vmem:[%s5636_s1 + $0x100] sm:$0xf]  ;;  %v3572_v22 = vld [vmem:[%s5636_s1 + $0x10c] sm:$0xf0]  ;;  %v2400_v32 = vor.u32 %v3540_v18, %v2399_v17  ;;  %1277 = vmatpush.bf16.msra.mxu2 %v2672_v21  ;;  %v3554_v18 = vld [vmem:[%s5636_s1 + $0x84] sm:$0xf] }
  0x1f   :  { %v2655_v23 = vld [vmem:[%s5636_s1 + $0x200] sm:$0xf]  ;;  %v3604_v24 = vld [vmem:[%s5636_s1 + $0x20c] sm:$0xf0]  ;;  %v2528_v36 = vor.u32 %v3572_v22, %v2527_v19  ;;  %1290 = vmatpush.bf16.msra.mxu3 %v2800_v25  ;;  %v2465_v19 = vld [vmem:[%s5636_s1 + $0x90] sm:$0xf0] }
  0x20   :  { %v2783_v26 = vld [vmem:[%s5636_s1 + $0x300] sm:$0xf]  ;;  %v3636_v27 = vld [vmem:[%s5636_s1 + $0x30c] sm:$0xf0]  ;;  %v2656_v37 = vor.u32 %v3604_v24, %v2655_v23  ;;  %1252 = vmatpush.bf16.msra.mxu0 %v2400_v32  ;;  %v3586_v22 = vld [vmem:[%s5636_s1 + $0x184] sm:$0xf]  ;;  %v2468_v25 = vor.u32 %v3554_v18, %v2465_v19 }
  0x21   :  { %v3023_v28 = vld [vmem:[%s5636_s1 + $0x4e0] sm:$0xf]  ;;  %v3696_v29 = vld [vmem:[%s5636_s1 + $0x4ec] sm:$0xf0]  ;;  %v2784_v41 = vor.u32 %v3636_v27, %v2783_v26  ;;  %1265 = vmatpush.bf16.msra.mxu1 %v2528_v36  ;;  %v2593_v23 = vld [vmem:[%s5636_s1 + $0x190] sm:$0xf0] }
  0x22   :  { %v3151_v30 = vld [vmem:[%s5636_s1 + $0x5e0] sm:$0xf]  ;;  %v3728_v31 = vld [vmem:[%s5636_s1 + $0x5ec] sm:$0xf0]  ;;  %v3024_v42 = vor.u32 %v3696_v29, %v3023_v28  ;;  %1278 = vmatpush.bf16.msra.mxu2 %v2656_v37  ;;  %v2596_v33 = vor.u32 %v3586_v22, %v2593_v23  ;;  %v2577_v36 = vld [vmem:[%s5636_s1 + $0x170] sm:$0xf0] }
  0x23   :  { %v43_v35 = vld [vmem:[%s5637_s0 + $0x10] sm:$0xff]  ;;  %v3167_v38 = vld [vmem:[%s5636_s1 + $0x600] sm:$0xf]  ;;  %v3152_v46 = vor.u32 %v3728_v31, %v3151_v30  ;;  %1291 = vmatpush.bf16.msra.mxu3 %v2784_v41  ;;  %v3550_v30 = vld [vmem:[%s5636_s1 + $0x64] sm:$0xf] }
  0x24   :  { %v3732_v39 = vld [vmem:[%s5636_s1 + $0x60c] sm:$0xf0]  ;;  %v41_v40 = vld [vmem:[%s5637_s0] sm:$0xff]  ;;  %v4131_v51 = vpack.c.bf16 %v43_v35, %v43_v35  ;;  %1297 = vmatpush.bf16.msrb.mxu0 %v3024_v42  ;;  %1266 = vmatmul.bf16.vlgmr.msra.gmra.mxu1 %v4175_v7  ;;  %v2449_v31 = vld [vmem:[%s5636_s1 + $0x70] sm:$0xf0] }
  0x25   :  { %v3007_v48 = vld [vmem:[%s5636_s1 + $0x4c0] sm:$0xf]  ;;  %v3692_v49 = vld [vmem:[%s5636_s1 + $0x4cc] sm:$0xf0]  ;;  %v4142_v55 = vpack.c.bf16 %v41_v40, %v41_v40  ;;  %v3168_v56 = vor.u32 %v3732_v39, %v3167_v38  ;;  %1310 = vmatpush.bf16.msrb.mxu1 %v3152_v46  ;;  %v3582_v35 = vld [vmem:[%s5636_s1 + $0x164] sm:$0xf]  ;;  %v2452_v38 = vor.u32 %v3550_v30, %v2449_v31 }
  0x26   :  { %v3135_v50 = vld [vmem:[%s5636_s1 + $0x5c0] sm:$0xf]  ;;  %v3724_v52 = vld [vmem:[%s5636_s1 + $0x5cc] sm:$0xf0]  ;;  %v3008_v60 = vor.u32 %v3692_v49, %v3007_v48  ;;  %1279 = vmatmul.bf16.vlgmr.msra.gmra.mxu2 %v4131_v51  ;;  %1292 = vmatmul.bf16.vlgmr.msra.gmra.mxu3 %v4144_v57  ;;  %v2433_v44 = vld [vmem:[%s5636_s1 + $0x50] sm:$0xf0]  ;;  %v2580_v46 = vor.u32 %v3582_v35, %v2577_v36 }
  0x27   :  { %1336 = vmatpush.bf16.msrb.mxu3 %v2516_v47  ;;  %v3136_v63 = vor.u32 %v3724_v52, %v3135_v50  ;;  %v2991_v1 = vld [vmem:[%s5636_s1 + $0x4a0] sm:$0xf]  ;;  %v3688_v2 = vld [vmem:[%s5636_s1 + $0x4ac] sm:$0xf0]  ;;  %1253 = vmatmul.bf16.vlgmr.msra.gmra.mxu0 %v4142_v55  ;;  %v3578_v48 = vld [vmem:[%s5636_s1 + $0x144] sm:$0xf]  ;;  %v2436_v52 = vor.u32 %v3546_v43, %v2433_v44 }
  0x28   :  { %v3119_v3 = vld [vmem:[%s5636_s1 + $0x5a0] sm:$0xf]  ;;  %v3720_v4 = vld [vmem:[%s5636_s1 + $0x5ac] sm:$0xf0]  ;;  %1330 = vmatpush.bf16.msrb.mxu2 %v3168_v56  ;;  %1298 = vmatpush.bf16.msrb.mxu0 %v3008_v60  ;;  %v2992_v9 = vor.u32 %v3688_v2, %v2991_v1  ;;  %v2561_v49 = vld [vmem:[%s5636_s1 + $0x150] sm:$0xf0] }
  0x29   :  { %1311 = vmatpush.bf16.msrb.mxu1 %v3136_v63  ;;  %v3120_v12 = vor.u32 %v3720_v4, %v3119_v3  ;;  %v2975_v14 = vld [vmem:[%s5636_s1 + $0x480] sm:$0xf]  ;;  %v3684_v15 = vld [vmem:[%s5636_s1 + $0x48c] sm:$0xf0]  ;;  %v2417_v60 = vld [vmem:[%s5636_s1 + $0x30] sm:$0xf0]  ;;  %v2564_v61 = vor.u32 %v3578_v48, %v2561_v49 }
  0x2a   :  { %v3103_v16 = vld [vmem:[%s5636_s1 + $0x580] sm:$0xf]  ;;  %v3716_v17 = vld [vmem:[%s5636_s1 + $0x58c] sm:$0xf0]  ;;  %v2976_v21 = vor.u32 %v3684_v15, %v2975_v14  ;;  %v3574_v63 = vld [vmem:[%s5636_s1 + $0x124] sm:$0xf] }
  0x2b   :  { %1337 = vmatpush.bf16.msrb.mxu3 %v2500_v0  ;;  %v3104_v24 = vor.u32 %v3716_v17, %v3103_v16  ;;  %v2959_v26 = vld [vmem:[%s5636_s1 + $0x460] sm:$0xf]  ;;  %v3680_v27 = vld [vmem:[%s5636_s1 + $0x46c] sm:$0xf0]  ;;  %v2545_v0 = vld [vmem:[%s5636_s1 + $0x130] sm:$0xf0] }
  0x2c   :  { %1349 = vmatpush.bf16.msra.mxu2 %v2644_v59  ;;  %1299 = vmatpush.bf16.msrb.mxu0 %v2992_v9  ;;  %v3087_v28 = vld [vmem:[%s5636_s1 + $0x560] sm:$0xf]  ;;  %v3712_v29 = vld [vmem:[%s5636_s1 + $0x56c] sm:$0xf0]  ;;  %v2960_v34 = vor.u32 %v3680_v27, %v2959_v26  ;;  %v3542_v59 = vld [vmem:[%s5636_s1 + $0x24] sm:$0xf]  ;;  %v2548_v14 = vor.u32 %v3574_v63, %v2545_v0 }
  0x2d   :  { %1312 = vmatpush.bf16.msrb.mxu1 %v3120_v12  ;;  %v47_v32 = vld [vmem:[%s5637_s0 + $0x30] sm:$0xff]  ;;  %v3088_v37 = vor.u32 %v3712_v29, %v3087_v28  ;;  %v2943_v39 = vld [vmem:[%s5636_s1 + $0x440] sm:$0xf]  ;;  %v2420_v3 = vor.u32 %v3542_v59, %v2417_v60  ;;  %v3630_v10 = vld [vmem:[%s5636_s1 + $0x2e4] sm:$0xf] }
  0x2e   :  { %v3676_v40 = vld [vmem:[%s5636_s1 + $0x44c] sm:$0xf0]  ;;  %v3071_v41 = vld [vmem:[%s5636_s1 + $0x540] sm:$0xf]  ;;  %v4254_v45 = vpack.c.bf16 %v47_v32, %v47_v32  ;;  %v2401_v9 = vld [vmem:[%s5636_s1 + $0x10] sm:$0xf0] }
  0x2f   :  { %1338 = vmatpush.bf16.msrb.mxu3 %v2484_v13  ;;  %v3708_v42 = vld [vmem:[%s5636_s1 + $0x54c] sm:$0xf0]  ;;  %v2944_v47 = vor.u32 %v3676_v40, %v2943_v39  ;;  %v2927_v53 = vld [vmem:[%s5636_s1 + $0x420] sm:$0xf]  ;;  %v2769_v11 = vld [vmem:[%s5636_s1 + $0x2f0] sm:$0xf0] }
  0x30   :  { %1350 = vmatpush.bf16.msra.mxu2 %v2628_v8  ;;  %1300 = vmatpush.bf16.msrb.mxu0 %v2976_v21  ;;  %v3072_v50 = vor.u32 %v3708_v42, %v3071_v41  ;;  %v3672_v54 = vld [vmem:[%s5636_s1 + $0x42c] sm:$0xf0]  ;;  %v3055_v56 = vld [vmem:[%s5636_s1 + $0x520] sm:$0xf]  ;;  %v3538_v8 = vld [vmem:[%s5636_s1 + $0x4] sm:$0xf] }
  0x31   :  { %1313 = vmatpush.bf16.msrb.mxu1 %v3104_v24  ;;  %v3704_v58 = vld [vmem:[%s5636_s1 + $0x52c] sm:$0xf0]  ;;  %v2928_v62 = vor.u32 %v3672_v54, %v2927_v53  ;;  %v2911_v1 = vld [vmem:[%s5636_s1 + $0x400] sm:$0xf]  ;;  %v3662_v12 = vld [vmem:[%s5636_s1 + $0x3e4] sm:$0xf]  ;;  %v2772_v24 = vor.u32 %v3630_v10, %v2769_v11 }
  0x32   :  { %v3056_v2 = vor.u32 %v3704_v58, %v3055_v56  ;;  %v3668_v4 = vld [vmem:[%s5636_s1 + $0x40c] sm:$0xf0]  ;;  %v3039_v5 = vld [vmem:[%s5636_s1 + $0x500] sm:$0xf]  ;;  %v2897_v13 = vld [vmem:[%s5636_s1 + $0x3f0] sm:$0xf0] }
  0x33   :  { %1339 = vmatpush.bf16.msrb.mxu3 %v2468_v25  ;;  %v3700_v6 = vld [vmem:[%s5636_s1 + $0x50c] sm:$0xf0]  ;;  %v2912_v15 = vor.u32 %v3668_v4, %v2911_v1  ;;  %v3694_v16 = vld [vmem:[%s5636_s1 + $0x4e4] sm:$0xf]  ;;  %v3025_v17 = vld [vmem:[%s5636_s1 + $0x4f0] sm:$0xf0]  ;;  %v2900_v25 = vor.u32 %v3662_v12, %v2897_v13 }
  0x34   :  { %1351 = vmatpush.bf16.msra.mxu2 %v2612_v20  ;;  %1301 = vmatpush.bf16.msrb.mxu0 %v2960_v34  ;;  %v45_v18 = vld [vmem:[%s5637_s0 + $0x20] sm:$0xff]  ;;  %v3040_v19 = vor.u32 %v3700_v6, %v3039_v5  ;;  %v2404_v20 = vor.u32 %v3538_v8, %v2401_v9  ;;  %v2529_v22 = vld [vmem:[%s5636_s1 + $0x110] sm:$0xf0]  ;;  %v46_v23 = vld [vmem:[%s5637_s0 + $0x28] sm:$0xff]  ;;  %v3028_v29 = vor.u32 %v3694_v16, %v3025_v17 }
  0x35   :  { %1314 = vmatpush.bf16.msrb.mxu1 %v3088_v37  ;;  %v3570_v21 = vld [vmem:[%s5636_s1 + $0x104] sm:$0xf]  ;;  %v3153_v27 = vld [vmem:[%s5636_s1 + $0x5f0] sm:$0xf0]  ;;  %v4345_v30 = vpack.c.bf16 %v45_v18, %v45_v18  ;;  %v4356_v35 = vpack.c.bf16 %v46_v23, %v46_v23 }
  0x36   :  { %3181 = vmatmul.msk.bf16.vlgmr.msrb.gmra.mxu2 %vm1241_vm0, %v4254_v45  ;;  %v3726_v26 = vld [vmem:[%s5636_s1 + $0x5e4] sm:$0xf]  ;;  %v2753_v31 = vld [vmem:[%s5636_s1 + $0x2d0] sm:$0xf0]  ;;  %v2532_v34 = vor.u32 %v3570_v21, %v2529_v22 }
  0x37   :  { %1340 = vmatpush.bf16.msrb.mxu3 %v2452_v38  ;;  %v3626_v28 = vld [vmem:[%s5636_s1 + $0x2c4] sm:$0xf]  ;;  %v3009_v37 = vld [vmem:[%s5636_s1 + $0x4d0] sm:$0xf0]  ;;  %v3156_v38 = vor.u32 %v3726_v26, %v3153_v27 }
  0x38   :  { %1352 = vmatpush.bf16.msra.mxu2 %v2596_v33  ;;  %1302 = vmatpush.bf16.msrb.mxu0 %v2944_v47  ;;  %v3658_v32 = vld [vmem:[%s5636_s1 + $0x3c4] sm:$0xf]  ;;  %v2881_v33 = vld [vmem:[%s5636_s1 + $0x3d0] sm:$0xf0]  ;;  %v2756_v39 = vor.u32 %v3626_v28, %v2753_v31 }
  0x39   :  { %1315 = vmatpush.bf16.msrb.mxu1 %v3072_v50  ;;  %v3690_v36 = vld [vmem:[%s5636_s1 + $0x4c4] sm:$0xf]  ;;  %v2884_v40 = vor.u32 %v3658_v32, %v2881_v33  ;;  %v3137_v42 = vld [vmem:[%s5636_s1 + $0x5d0] sm:$0xf0] }
  0x3a   :  { %v3722_v41 = vld [vmem:[%s5636_s1 + $0x5c4] sm:$0xf]  ;;  %v3012_v44 = vor.u32 %v3690_v36, %v3009_v37  ;;  %v2865_v48 = vld [vmem:[%s5636_s1 + $0x3b0] sm:$0xf0] }
  0x3b   :  { %1341 = vmatpush.bf16.msrb.mxu3 %v2436_v52  ;;  %v3622_v43 = vld [vmem:[%s5636_s1 + $0x2a4] sm:$0xf]  ;;  %v2993_v50 = vld [vmem:[%s5636_s1 + $0x4b0] sm:$0xf0]  ;;  %v3140_v52 = vor.u32 %v3722_v41, %v3137_v42 }
  0x3c   :  { %1353 = vmatpush.bf16.msra.mxu2 %v2580_v46  ;;  %1303 = vmatpush.bf16.msrb.mxu0 %v2928_v62  ;;  %v2737_v46 = vld [vmem:[%s5636_s1 + $0x2b0] sm:$0xf0]  ;;  %v3654_v47 = vld [vmem:[%s5636_s1 + $0x3a4] sm:$0xf] }
  0x3d   :  { %1316 = vmatpush.bf16.msrb.mxu1 %v3056_v2  ;;  %v3686_v49 = vld [vmem:[%s5636_s1 + $0x4a4] sm:$0xf]  ;;  %v2740_v53 = vor.u32 %v3622_v43, %v2737_v46  ;;  %v2868_v54 = vor.u32 %v3654_v47, %v2865_v48  ;;  %v3121_v58 = vld [vmem:[%s5636_s1 + $0x5b0] sm:$0xf0] }
  0x3e   :  { %v3718_v56 = vld [vmem:[%s5636_s1 + $0x5a4] sm:$0xf]  ;;  %v2996_v60 = vor.u32 %v3686_v49, %v2993_v50  ;;  %v2849_v63 = vld [vmem:[%s5636_s1 + $0x390] sm:$0xf0] }
  0x3f   :  { %1342 = vmatpush.bf16.msrb.mxu3 %v2420_v3  ;;  %v3618_v59 = vld [vmem:[%s5636_s1 + $0x284] sm:$0xf]  ;;  %v2977_v1 = vld [vmem:[%s5636_s1 + $0x490] sm:$0xf0]  ;;  %v3124_v2 = vor.u32 %v3718_v56, %v3121_v58  ;;  %v2519_v56 = vld [vmem:[%s5636_s1 + $0xe8] sm:$0xf] }
  0x40   :  { %1354 = vmatpush.bf16.msra.mxu2 %v2564_v61  ;;  %1304 = vmatpush.bf16.msrb.mxu0 %v2912_v15  ;;  %v2721_v61 = vld [vmem:[%s5636_s1 + $0x290] sm:$0xf0]  ;;  %v3650_v62 = vld [vmem:[%s5636_s1 + $0x384] sm:$0xf]  ;;  %v3569_v58 = vld [vmem:[%s5636_s1 + $0xf4] sm:$0xf0] }
  0x41   :  { %1317 = vmatpush.bf16.msrb.mxu1 %v3040_v19  ;;  %v3682_v0 = vld [vmem:[%s5636_s1 + $0x484] sm:$0xf]  ;;  %v2724_v3 = vor.u32 %v3618_v59, %v2721_v61  ;;  %v2852_v4 = vor.u32 %v3650_v62, %v2849_v63  ;;  %v3105_v6 = vld [vmem:[%s5636_s1 + $0x590] sm:$0xf0]  ;;  %v2647_v59 = vld [vmem:[%s5636_s1 + $0x1e8] sm:$0xf] }
  0x42   :  { %v3714_v5 = vld [vmem:[%s5636_s1 + $0x584] sm:$0xf]  ;;  %v2980_v9 = vor.u32 %v3682_v0, %v2977_v1  ;;  %v2705_v10 = vld [vmem:[%s5636_s1 + $0x270] sm:$0xf0]  ;;  %v3601_v61 = vld [vmem:[%s5636_s1 + $0x1f4] sm:$0xf0] }
  0x43   :  { %1343 = vmatpush.bf16.msrb.mxu3 %v2404_v20  ;;  %1305 = vmatmul.bf16.vlgmr.msrb.gmra.mxu0 %v4345_v30  ;;  %v3614_v8 = vld [vmem:[%s5636_s1 + $0x264] sm:$0xf]  ;;  %v2833_v12 = vld [vmem:[%s5636_s1 + $0x370] sm:$0xf0]  ;;  %v3108_v15 = vor.u32 %v3714_v5, %v3105_v6  ;;  %v2520_v6 = vor.u32 %v3569_v58, %v2519_v56  ;;  %v3553_v56 = vld [vmem:[%s5636_s1 + $0x74] sm:$0xf0] }
  0x44   :  { %1355 = vmatpush.bf16.msra.mxu2 %v2548_v14  ;;  %1362 = vmatpush.bf16.msra.mxu0 %v2772_v24  ;;  %v3646_v11 = vld [vmem:[%s5636_s1 + $0x364] sm:$0xf]  ;;  %v2961_v14 = vld [vmem:[%s5636_s1 + $0x470] sm:$0xf0]  ;;  %v2708_v16 = vor.u32 %v3614_v8, %v2705_v10  ;;  %v3633_v8 = vld [vmem:[%s5636_s1 + $0x2f4] sm:$0xf0] }
  0x45   :  { %1375 = vmatpush.bf16.msra.mxu1 %v2900_v25  ;;  %v3678_v13 = vld [vmem:[%s5636_s1 + $0x464] sm:$0xf]  ;;  %v2836_v17 = vor.u32 %v3646_v11, %v2833_v12  ;;  %v3089_v19 = vld [vmem:[%s5636_s1 + $0x570] sm:$0xf0]  ;;  %v3665_v10 = vld [vmem:[%s5636_s1 + $0x3f4] sm:$0xf0]  ;;  %v2648_v11 = vor.u32 %v3601_v61, %v2647_v59 }
  0x46   :  { %1318 = vmatmul.bf16.vlgmr.msrb.gmra.mxu1 %v4356_v35  ;;  %1344 = vmatmul.bf16.vlgmr.msrb.gmra.mxu3 %v4142_v55  ;;  %v3710_v18 = vld [vmem:[%s5636_s1 + $0x564] sm:$0xf]  ;;  %v2964_v21 = vor.u32 %v3678_v13, %v2961_v14  ;;  %v2689_v22 = vld [vmem:[%s5636_s1 + $0x250] sm:$0xf0]  ;;  %v2503_v13 = vld [vmem:[%s5636_s1 + $0xc8] sm:$0xf] }
  0x47   :  { %1388 = vmatpush.bf16.msra.mxu3 %v3028_v29  ;;  %v3610_v20 = vld [vmem:[%s5636_s1 + $0x244] sm:$0xf]  ;;  %v2817_v24 = vld [vmem:[%s5636_s1 + $0x350] sm:$0xf0]  ;;  %v3092_v27 = vor.u32 %v3710_v18, %v3089_v19  ;;  %v3565_v14 = vld [vmem:[%s5636_s1 + $0xd4] sm:$0xf0] }
  0x48   :  { %1356 = vmatpush.bf16.msra.mxu2 %v2532_v34  ;;  %1363 = vmatpush.bf16.msra.mxu0 %v2756_v39  ;;  %v3642_v23 = vld [vmem:[%s5636_s1 + $0x344] sm:$0xf]  ;;  %v2945_v26 = vld [vmem:[%s5636_s1 + $0x450] sm:$0xf0]  ;;  %v2692_v28 = vor.u32 %v3610_v20, %v2689_v22  ;;  %v2759_v20 = vld [vmem:[%s5636_s1 + $0x2c8] sm:$0xf] }
  0x49   :  { %1376 = vmatpush.bf16.msra.mxu1 %v2884_v40  ;;  %v3674_v25 = vld [vmem:[%s5636_s1 + $0x444] sm:$0xf]  ;;  %v2820_v29 = vor.u32 %v3642_v23, %v2817_v24  ;;  %v3073_v32 = vld [vmem:[%s5636_s1 + $0x550] sm:$0xf0]  ;;  %v3629_v22 = vld [vmem:[%s5636_s1 + $0x2d4] sm:$0xf0] }
  0x4a   :  { %v3706_v31 = vld [vmem:[%s5636_s1 + $0x544] sm:$0xf]  ;;  %v2948_v34 = vor.u32 %v3674_v25, %v2945_v26  ;;  %v2673_v36 = vld [vmem:[%s5636_s1 + $0x230] sm:$0xf0]  ;;  %v2887_v23 = vld [vmem:[%s5636_s1 + $0x3c8] sm:$0xf] }
  0x4b   :  { %1389 = vmatpush.bf16.msra.mxu3 %v3012_v44  ;;  %1357 = vmatmul.bf16.vlgmr.msra.gmra.mxu2 %v4175_v7  ;;  %v3606_v33 = vld [vmem:[%s5636_s1 + $0x224] sm:$0xf]  ;;  %v2929_v40 = vld [vmem:[%s5636_s1 + $0x430] sm:$0xf0]  ;;  %v3076_v41 = vor.u32 %v3706_v31, %v3073_v32  ;;  %v3661_v24 = vld [vmem:[%s5636_s1 + $0x3d4] sm:$0xf0]  ;;  %v2760_v31 = vor.u32 %v3629_v22, %v2759_v20 }
  0x4c   :  { %1401 = vmatpush.bf16.msrb.mxu2 %v3156_v38  ;;  %1364 = vmatpush.bf16.msra.mxu0 %v2740_v53  ;;  %v3638_v37 = vld [vmem:[%s5636_s1 + $0x324] sm:$0xf]  ;;  %v2801_v38 = vld [vmem:[%s5636_s1 + $0x330] sm:$0xf0]  ;;  %v2676_v44 = vor.u32 %v3606_v33, %v2673_v36  ;;  %v2487_v26 = vld [vmem:[%s5636_s1 + $0xa8] sm:$0xf]  ;;  %v2888_v32 = vor.u32 %v3661_v24, %v2887_v23 }
  0x4d   :  { %1377 = vmatpush.bf16.msra.mxu1 %v2868_v54  ;;  %v3670_v39 = vld [vmem:[%s5636_s1 + $0x424] sm:$0xf]  ;;  %v3057_v43 = vld [vmem:[%s5636_s1 + $0x530] sm:$0xf0]  ;;  %v2804_v46 = vor.u32 %v3638_v37, %v2801_v38  ;;  %v2743_v33 = vld [vmem:[%s5636_s1 + $0x2a8] sm:$0xf] }
  0x4e   :  { %v3702_v42 = vld [vmem:[%s5636_s1 + $0x524] sm:$0xf]  ;;  %v2657_v48 = vld [vmem:[%s5636_s1 + $0x210] sm:$0xf0]  ;;  %v2932_v50 = vor.u32 %v3670_v39, %v2929_v40  ;;  %v3625_v36 = vld [vmem:[%s5636_s1 + $0x2b4] sm:$0xf0] }
  0x4f   :  { %1390 = vmatpush.bf16.msra.mxu3 %v2996_v60  ;;  %v3602_v47 = vld [vmem:[%s5636_s1 + $0x204] sm:$0xf]  ;;  %v2913_v54 = vld [vmem:[%s5636_s1 + $0x410] sm:$0xf0]  ;;  %v3060_v60 = vor.u32 %v3702_v42, %v3057_v43  ;;  %v2871_v37 = vld [vmem:[%s5636_s1 + $0x3a8] sm:$0xf] }
  0x50   :  { %1402 = vmatpush.bf16.msrb.mxu2 %v3140_v52  ;;  %1365 = vmatpush.bf16.msra.mxu0 %v2724_v3  ;;  %v3634_v49 = vld [vmem:[%s5636_s1 + $0x304] sm:$0xf]  ;;  %v2785_v52 = vld [vmem:[%s5636_s1 + $0x310] sm:$0xf0]  ;;  %v2660_v0 = vor.u32 %v3602_v47, %v2657_v48  ;;  %v3657_v38 = vld [vmem:[%s5636_s1 + $0x3b4] sm:$0xf0] }
  0x51   :  { %1378 = vmatpush.bf16.msra.mxu1 %v2852_v4  ;;  %v3666_v53 = vld [vmem:[%s5636_s1 + $0x404] sm:$0xf]  ;;  %v3169_v63 = vld [vmem:[%s5636_s1 + $0x610] sm:$0xf0]  ;;  %v2788_v1 = vor.u32 %v3634_v49, %v2785_v52  ;;  %v2775_v4 = vld [vmem:[%s5636_s1 + $0x2e8] sm:$0xf] }
  0x52   :  { %v3730_v62 = vld [vmem:[%s5636_s1 + $0x604] sm:$0xf]  ;;  %v3041_v3 = vld [vmem:[%s5636_s1 + $0x510] sm:$0xf0]  ;;  %v2916_v5 = vor.u32 %v3666_v53, %v2913_v54  ;;  %v2776_v18 = vor.u32 %v3633_v8, %v2775_v4  ;;  %v2471_v40 = vld [vmem:[%s5636_s1 + $0x88] sm:$0xf] }
  0x53   :  { %1391 = vmatpush.bf16.msra.mxu3 %v2980_v9  ;;  %v2903_v9 = vld [vmem:[%s5636_s1 + $0x3e8] sm:$0xf]  ;;  %v3172_v12 = vor.u32 %v3730_v62, %v3169_v63  ;;  %v3589_v43 = vld [vmem:[%s5636_s1 + $0x194] sm:$0xf0] }
  0x54   :  { %1403 = vmatpush.bf16.msrb.mxu2 %v3124_v2  ;;  %1366 = vmatpush.bf16.msra.mxu0 %v2708_v16  ;;  %v3698_v2 = vld [vmem:[%s5636_s1 + $0x504] sm:$0xf]  ;;  %v2631_v16 = vld [vmem:[%s5636_s1 + $0x1c8] sm:$0xf]  ;;  %v2904_v19 = vor.u32 %v3665_v10, %v2903_v9  ;;  %v3621_v49 = vld [vmem:[%s5636_s1 + $0x294] sm:$0xf0] }
  0x55   :  { %1379 = vmatpush.bf16.msra.mxu1 %v2836_v17  ;;  %v3597_v17 = vld [vmem:[%s5636_s1 + $0x1d4] sm:$0xf0]  ;;  %v2599_v42 = vld [vmem:[%s5636_s1 + $0x188] sm:$0xf] }
  0x56   :  { %v2632_v25 = vor.u32 %v3597_v17, %v2631_v16  ;;  %v2727_v47 = vld [vmem:[%s5636_s1 + $0x288] sm:$0xf]  ;;  %v3653_v52 = vld [vmem:[%s5636_s1 + $0x394] sm:$0xf0]  ;;  %v2600_v53 = vor.u32 %v3589_v43, %v2599_v42 }
  0x57   :  { %1392 = vmatpush.bf16.msra.mxu3 %v2964_v21  ;;  %v2504_v21 = vor.u32 %v3565_v14, %v2503_v13  ;;  %v2455_v54 = vld [vmem:[%s5636_s1 + $0x68] sm:$0xf]  ;;  %v3585_v59 = vld [vmem:[%s5636_s1 + $0x174] sm:$0xf0] }
  0x58   :  { %1404 = vmatpush.bf16.msrb.mxu2 %v3108_v15  ;;  %1367 = vmatpush.bf16.msra.mxu0 %v2692_v28  ;;  %v3044_v15 = vor.u32 %v3698_v2, %v3041_v3  ;;  %v2615_v28 = vld [vmem:[%s5636_s1 + $0x1a8] sm:$0xf]  ;;  %v2456_v63 = vor.u32 %v3553_v56, %v2455_v54  ;;  %v3649_v2 = vld [vmem:[%s5636_s1 + $0x374] sm:$0xf0] }
  0x59   :  { %1380 = vmatpush.bf16.msra.mxu1 %v2820_v29  ;;  %v3593_v29 = vld [vmem:[%s5636_s1 + $0x1b4] sm:$0xf0]  ;;  %v2583_v58 = vld [vmem:[%s5636_s1 + $0x168] sm:$0xf] }
  0x5a   :  { %v2616_v39 = vor.u32 %v3593_v29, %v2615_v28  ;;  %v2711_v62 = vld [vmem:[%s5636_s1 + $0x268] sm:$0xf]  ;;  %v2584_v3 = vor.u32 %v3585_v59, %v2583_v58  ;;  %v3581_v8 = vld [vmem:[%s5636_s1 + $0x154] sm:$0xf0] }
  0x5b   :  { %1393 = vmatpush.bf16.msra.mxu3 %v2948_v34  ;;  %v2439_v4 = vld [vmem:[%s5636_s1 + $0x48] sm:$0xf]  ;;  %v3613_v13 = vld [vmem:[%s5636_s1 + $0x254] sm:$0xf0] }
  0x5c   :  { %1405 = vmatpush.bf16.msrb.mxu2 %v3092_v27  ;;  %1368 = vmatpush.bf16.msra.mxu0 %v2676_v44  ;;  %v3561_v27 = vld [vmem:[%s5636_s1 + $0xb4] sm:$0xf0]  ;;  %v2744_v44 = vor.u32 %v3625_v36, %v2743_v33  ;;  %v2823_v14 = vld [vmem:[%s5636_s1 + $0x348] sm:$0xf] }
  0x5d   :  { %1381 = vmatpush.bf16.msra.mxu1 %v2804_v46  ;;  %v2488_v34 = vor.u32 %v3561_v27, %v2487_v26  ;;  %v2872_v46 = vor.u32 %v3657_v38, %v2871_v37  ;;  %v2423_v17 = vld [vmem:[%s5636_s1 + $0x28] sm:$0xf]  ;;  %v3577_v20 = vld [vmem:[%s5636_s1 + $0x134] sm:$0xf0] }
  0x5e   :  { %v2679_v23 = vld [vmem:[%s5636_s1 + $0x228] sm:$0xf]  ;;  %v3609_v24 = vld [vmem:[%s5636_s1 + $0x234] sm:$0xf0] }
  0x5f   :  { %1394 = vmatpush.bf16.msra.mxu3 %v2932_v50  ;;  %v2855_v50 = vld [vmem:[%s5636_s1 + $0x388] sm:$0xf]  ;;  %v3641_v27 = vld [vmem:[%s5636_s1 + $0x334] sm:$0xf0]  ;;  %v2680_v38 = vor.u32 %v3609_v24, %v2679_v23 }
  0x60   :  { %1406 = vmatpush.bf16.msrb.mxu2 %v3076_v41  ;;  %1369 = vmatpush.bf16.msra.mxu0 %v2660_v0  ;;  %v3557_v41 = vld [vmem:[%s5636_s1 + $0x94] sm:$0xf0]  ;;  %v2856_v61 = vor.u32 %v3653_v52, %v2855_v50  ;;  %v2807_v26 = vld [vmem:[%s5636_s1 + $0x328] sm:$0xf]  ;;  %v2521_v50 = vld [vmem:[%s5636_s1 + $0xf8] sm:$0xf0] }
  0x61   :  { %1382 = vmatpush.bf16.msra.mxu1 %v2788_v1  ;;  %v2472_v48 = vor.u32 %v3557_v41, %v2471_v40  ;;  %v3617_v0 = vld [vmem:[%s5636_s1 + $0x274] sm:$0xf0]  ;;  %v2839_v1 = vld [vmem:[%s5636_s1 + $0x368] sm:$0xf] }
  0x62   :  { %v2712_v9 = vor.u32 %v3617_v0, %v2711_v62  ;;  %v2840_v10 = vor.u32 %v3649_v2, %v2839_v1  ;;  %v2407_v28 = vld [vmem:[%s5636_s1 + $0x8] sm:$0xf]  ;;  %v3573_v33 = vld [vmem:[%s5636_s1 + $0x114] sm:$0xf0]  ;;  %v3599_v1 = vld [vmem:[%s5636_s1 + $0x1ec] sm:$0xf] }
  0x63   :  { %1395 = vmatpush.bf16.msra.mxu3 %v2916_v5  ;;  %1370 = vmatmul.bf16.vlgmr.msra.gmra.mxu0 %v4131_v51  ;;  %v3549_v5 = vld [vmem:[%s5636_s1 + $0x54] sm:$0xf0]  ;;  %v3159_v37 = vld [vmem:[%s5636_s1 + $0x5e8] sm:$0xf]  ;;  %v2649_v2 = vld [vmem:[%s5636_s1 + $0x1f8] sm:$0xf0] }
  0x64   :  { %1407 = vmatpush.bf16.msrb.mxu2 %v3060_v60  ;;  %1421 = vmatpush.bf16.msrb.mxu0 %v3172_v12  ;;  %v2728_v60 = vor.u32 %v3621_v49, %v2727_v47  ;;  %v2440_v12 = vor.u32 %v3549_v5, %v2439_v4  ;;  %v3697_v36 = vld [vmem:[%s5636_s1 + $0x4f4] sm:$0xf0]  ;;  %v2663_v41 = vld [vmem:[%s5636_s1 + $0x208] sm:$0xf]  ;;  %v3567_v47 = vld [vmem:[%s5636_s1 + $0xec] sm:$0xf] }
  0x65   :  { %1427 = vmatpush.bf16.msrb.mxu1 %v2520_v6  ;;  %v2567_v6 = vld [vmem:[%s5636_s1 + $0x148] sm:$0xf]  ;;  %v3729_v40 = vld [vmem:[%s5636_s1 + $0x5f4] sm:$0xf0]  ;;  %v3563_v4 = vld [vmem:[%s5636_s1 + $0xcc] sm:$0xf] }
  0x66   :  { %1396 = vmatmul.bf16.vlgmr.msra.gmra.mxu3 %v4345_v30  ;;  %1383 = vmatmul.bf16.vlgmr.msra.gmra.mxu1 %v4144_v57  ;;  %v2568_v16 = vor.u32 %v3581_v8, %v2567_v6  ;;  %v3605_v42 = vld [vmem:[%s5636_s1 + $0x214] sm:$0xf0]  ;;  %v3175_v52 = vld [vmem:[%s5636_s1 + $0x608] sm:$0xf]  ;;  %v3160_v54 = vor.u32 %v3729_v40, %v3159_v37  ;;  %v2505_v5 = vld [vmem:[%s5636_s1 + $0xd8] sm:$0xf0] }
  0x67   :  { %1440 = vmatpush.bf16.msrb.mxu3 %v2648_v11  ;;  %v2695_v11 = vld [vmem:[%s5636_s1 + $0x248] sm:$0xf]  ;;  %v3693_v58 = vld [vmem:[%s5636_s1 + $0x4d4] sm:$0xf0]  ;;  %v2664_v59 = vor.u32 %v3605_v42, %v2663_v41  ;;  %v3587_v40 = vld [vmem:[%s5636_s1 + $0x18c] sm:$0xf] }
  0x68   :  { %1408 = vmatpush.bf16.msrb.mxu2 %v3044_v15  ;;  %1453 = vmatpush.bf16.msra.mxu0 %v2776_v18  ;;  %v3645_v15 = vld [vmem:[%s5636_s1 + $0x354] sm:$0xf0]  ;;  %v3015_v56 = vld [vmem:[%s5636_s1 + $0x4c8] sm:$0xf]  ;;  %v2601_v41 = vld [vmem:[%s5636_s1 + $0x198] sm:$0xf0] }
  0x69   :  { %1428 = vmatpush.bf16.msrb.mxu1 %v2504_v21  ;;  %v3545_v18 = vld [vmem:[%s5636_s1 + $0x34] sm:$0xf0]  ;;  %v2696_v21 = vor.u32 %v3613_v13, %v2695_v11  ;;  %v2824_v22 = vor.u32 %v3645_v15, %v2823_v14  ;;  %v2999_v8 = vld [vmem:[%s5636_s1 + $0x4a8] sm:$0xf]  ;;  %v2508_v13 = vor.u32 %v3563_v4, %v2505_v5  ;;  %v3595_v14 = vld [vmem:[%s5636_s1 + $0x1cc] sm:$0xf] }
  0x6a   :  { %v3725_v62 = vld [vmem:[%s5636_s1 + $0x5d4] sm:$0xf0]  ;;  %v3127_v11 = vld [vmem:[%s5636_s1 + $0x5a8] sm:$0xf]  ;;  %v2633_v15 = vld [vmem:[%s5636_s1 + $0x1d8] sm:$0xf0] }
  0x6b   :  { %1441 = vmatpush.bf16.msrb.mxu3 %v2632_v25  ;;  %1409 = vmatmul.bf16.vlgmr.msrb.gmra.mxu2 %v4356_v35  ;;  %v2424_v25 = vor.u32 %v3545_v18, %v2423_v17  ;;  %v3559_v17 = vld [vmem:[%s5636_s1 + $0xac] sm:$0xf]  ;;  %v2489_v18 = vld [vmem:[%s5636_s1 + $0xb8] sm:$0xf0]  ;;  %v3111_v23 = vld [vmem:[%s5636_s1 + $0x588] sm:$0xf] }
  0x6c   :  { %1466 = vmatpush.bf16.msra.mxu2 %v2904_v19  ;;  %1454 = vmatpush.bf16.msra.mxu0 %v2760_v31  ;;  %v2551_v19 = vld [vmem:[%s5636_s1 + $0x128] sm:$0xf]  ;;  %v3541_v31 = vld [vmem:[%s5636_s1 + $0x14] sm:$0xf0]  ;;  %v3579_v4 = vld [vmem:[%s5636_s1 + $0x14c] sm:$0xf] }
  0x6d   :  { %1429 = vmatpush.bf16.msrb.mxu1 %v2488_v34  ;;  %v2552_v29 = vor.u32 %v3577_v20, %v2551_v19  ;;  %v3031_v34 = vld [vmem:[%s5636_s1 + $0x4e8] sm:$0xf]  ;;  %v2408_v43 = vor.u32 %v3541_v31, %v2407_v28  ;;  %v3717_v24 = vld [vmem:[%s5636_s1 + $0x594] sm:$0xf0]  ;;  %v2473_v31 = vld [vmem:[%s5636_s1 + $0x98] sm:$0xf0] }
  0x6e   :  { %v3032_v49 = vor.u32 %v3697_v36, %v3031_v34  ;;  %v2983_v20 = vld [vmem:[%s5636_s1 + $0x488] sm:$0xf]  ;;  %v3681_v34 = vld [vmem:[%s5636_s1 + $0x474] sm:$0xf0]  ;;  %v2569_v5 = vld [vmem:[%s5636_s1 + $0x158] sm:$0xf0] }
  0x6f   :  { %1442 = vmatpush.bf16.msrb.mxu3 %v2616_v39  ;;  %v2808_v39 = vor.u32 %v3641_v27, %v2807_v26  ;;  %v3591_v26 = vld [vmem:[%s5636_s1 + $0x1ac] sm:$0xf]  ;;  %v2617_v27 = vld [vmem:[%s5636_s1 + $0x1b8] sm:$0xf0]  ;;  %v3095_v37 = vld [vmem:[%s5636_s1 + $0x568] sm:$0xf] }
  0x70   :  { %1467 = vmatpush.bf16.msra.mxu2 %v2888_v32  ;;  %1455 = vmatpush.bf16.msra.mxu0 %v2744_v44  ;;  %v2535_v32 = vld [vmem:[%s5636_s1 + $0x108] sm:$0xf]  ;;  %v2620_v36 = vor.u32 %v3591_v26, %v2617_v27 }
  0x71   :  { %1430 = vmatpush.bf16.msrb.mxu1 %v2472_v48  ;;  %v2791_v44 = vld [vmem:[%s5636_s1 + $0x308] sm:$0xf]  ;;  %v2536_v48 = vor.u32 %v3573_v33, %v2535_v32  ;;  %v3112_v32 = vor.u32 %v3717_v24, %v3111_v23  ;;  %v3539_v24 = vld [vmem:[%s5636_s1 + $0xc] sm:$0xf] }
  0x72   :  { %v2967_v33 = vld [vmem:[%s5636_s1 + $0x468] sm:$0xf] }
  0x73   :  { %1443 = vmatpush.bf16.msrb.mxu3 %v2600_v53  ;;  %3182 = vmatmul.msk.bf16.vlgmr.msrb.gmra.mxu0 %vm1241_vm0, %v4254_v45  ;;  %v3733_v53 = vld [vmem:[%s5636_s1 + $0x614] sm:$0xf0]  ;;  %v2968_v42 = vor.u32 %v3681_v34, %v2967_v33  ;;  %v3627_v33 = vld [vmem:[%s5636_s1 + $0x2cc] sm:$0xf]  ;;  %v2761_v34 = vld [vmem:[%s5636_s1 + $0x2d8] sm:$0xf0] }
  0x74   :  { %1468 = vmatpush.bf16.msra.mxu2 %v2872_v46  ;;  %1456 = vmatpush.bf16.msra.mxu0 %v2728_v60  ;;  %v3637_v46 = vld [vmem:[%s5636_s1 + $0x314] sm:$0xf0]  ;;  %v3176_v0 = vor.u32 %v3733_v53, %v3175_v52 }
  0x75   :  { %1431 = vmatpush.bf16.msrb.mxu1 %v2456_v63  ;;  %v2792_v60 = vor.u32 %v3637_v46, %v2791_v44  ;;  %v2524_v63 = vor.u32 %v3567_v47, %v2521_v50  ;;  %v2457_v44 = vld [vmem:[%s5636_s1 + $0x78] sm:$0xf0]  ;;  %v2951_v47 = vld [vmem:[%s5636_s1 + $0x448] sm:$0xf]  ;;  %v3709_v52 = vld [vmem:[%s5636_s1 + $0x554] sm:$0xf0] }
  0x76   :  { %v3079_v50 = vld [vmem:[%s5636_s1 + $0x548] sm:$0xf] }
  0x77   :  { %1444 = vmatpush.bf16.msrb.mxu3 %v2584_v3  ;;  %v3016_v3 = vor.u32 %v3693_v58, %v3015_v56  ;;  %v2585_v56 = vld [vmem:[%s5636_s1 + $0x178] sm:$0xf0] }
  0x78   :  { %1469 = vmatpush.bf16.msra.mxu2 %v2856_v61  ;;  %1457 = vmatpush.bf16.msra.mxu0 %v2712_v9  ;;  %v3143_v61 = vld [vmem:[%s5636_s1 + $0x5c8] sm:$0xf]  ;;  %v3689_v9 = vld [vmem:[%s5636_s1 + $0x4b4] sm:$0xf0] }
  0x79   :  { %1432 = vmatpush.bf16.msrb.mxu1 %v2440_v12  ;;  %v3144_v6 = vor.u32 %v3725_v62, %v3143_v61  ;;  %v3721_v12 = vld [vmem:[%s5636_s1 + $0x5b4] sm:$0xf0]  ;;  %v3080_v61 = vor.u32 %v3709_v52, %v3079_v50  ;;  %v2935_v62 = vld [vmem:[%s5636_s1 + $0x428] sm:$0xf]  ;;  %v3623_v50 = vld [vmem:[%s5636_s1 + $0x2ac] sm:$0xf] }
  0x7a   :  { %v3128_v19 = vor.u32 %v3721_v12, %v3127_v11  ;;  %v3669_v12 = vld [vmem:[%s5636_s1 + $0x414] sm:$0xf0]  ;;  %v2745_v52 = vld [vmem:[%s5636_s1 + $0x2b8] sm:$0xf0] }
  0x7b   :  { %1445 = vmatpush.bf16.msrb.mxu3 %v2568_v16  ;;  %v3000_v16 = vor.u32 %v3689_v9, %v2999_v8  ;;  %v3543_v8 = vld [vmem:[%s5636_s1 + $0x2c] sm:$0xf]  ;;  %v2425_v9 = vld [vmem:[%s5636_s1 + $0x38] sm:$0xf0] }
  0x7c   :  { %1470 = vmatpush.bf16.msra.mxu2 %v2840_v10  ;;  %1458 = vmatpush.bf16.msra.mxu0 %v2696_v21  ;;  %v2652_v10 = vor.u32 %v3599_v1, %v2649_v2  ;;  %v3685_v21 = vld [vmem:[%s5636_s1 + $0x494] sm:$0xf0]  ;;  %v3063_v1 = vld [vmem:[%s5636_s1 + $0x528] sm:$0xf] }
  0x7d   :  { %1433 = vmatpush.bf16.msrb.mxu1 %v2424_v25  ;;  %v2492_v25 = vor.u32 %v3559_v17, %v2489_v18  ;;  %v2984_v28 = vor.u32 %v3685_v21, %v2983_v20  ;;  %v3705_v2 = vld [vmem:[%s5636_s1 + $0x534] sm:$0xf0]  ;;  %v2777_v17 = vld [vmem:[%s5636_s1 + $0x2f8] sm:$0xf0]  ;;  %v3663_v18 = vld [vmem:[%s5636_s1 + $0x3ec] sm:$0xf] }
  0x7e   :  { %v3064_v11 = vor.u32 %v3705_v2, %v3063_v1  ;;  %v2905_v20 = vld [vmem:[%s5636_s1 + $0x3f8] sm:$0xf0]  ;;  %v3575_v21 = vld [vmem:[%s5636_s1 + $0x12c] sm:$0xf] }
  0x7f   :  { %1446 = vmatpush.bf16.msrb.mxu3 %v2552_v29  ;;  %v3555_v29 = vld [vmem:[%s5636_s1 + $0x8c] sm:$0xf]  ;;  %v2729_v2 = vld [vmem:[%s5636_s1 + $0x298] sm:$0xf0] }
  0x80   :  { %1471 = vmatpush.bf16.msra.mxu2 %v2824_v22  ;;  %1459 = vmatpush.bf16.msra.mxu0 %v2680_v38  ;;  %v2636_v22 = vor.u32 %v3595_v14, %v2633_v15  ;;  %v3713_v38 = vld [vmem:[%s5636_s1 + $0x574] sm:$0xf0]  ;;  %v2572_v15 = vor.u32 %v3579_v4, %v2569_v5  ;;  %v3619_v1 = vld [vmem:[%s5636_s1 + $0x28c] sm:$0xf]  ;;  %v2857_v5 = vld [vmem:[%s5636_s1 + $0x398] sm:$0xf0] }
  0x81   :  { %1434 = vmatpush.bf16.msrb.mxu1 %v2408_v43  ;;  %v3551_v43 = vld [vmem:[%s5636_s1 + $0x6c] sm:$0xf]  ;;  %v3096_v46 = vor.u32 %v3713_v38, %v3095_v37  ;;  %v3701_v14 = vld [vmem:[%s5636_s1 + $0x514] sm:$0xf0]  ;;  %v2889_v38 = vld [vmem:[%s5636_s1 + $0x3d8] sm:$0xf0] }
  0x82   :  { %v2460_v53 = vor.u32 %v3551_v43, %v2457_v44  ;;  %v3161_v43 = vld [vmem:[%s5636_s1 + $0x5f8] sm:$0xf0]  ;;  %v2764_v44 = vor.u32 %v3627_v33, %v2761_v34  ;;  %v3651_v4 = vld [vmem:[%s5636_s1 + $0x38c] sm:$0xf] }
  0x83   :  { %1447 = vmatpush.bf16.msrb.mxu3 %v2536_v48  ;;  %v3677_v48 = vld [vmem:[%s5636_s1 + $0x454] sm:$0xf0]  ;;  %v3711_v33 = vld [vmem:[%s5636_s1 + $0x56c] sm:$0xf]  ;;  %v3097_v34 = vld [vmem:[%s5636_s1 + $0x578] sm:$0xf0] }
  0x84   :  { %1472 = vmatpush.bf16.msra.mxu2 %v2808_v39  ;;  %1460 = vmatpush.bf16.msra.mxu0 %v2664_v59  ;;  %v2476_v39 = vor.u32 %v3555_v29, %v2473_v31  ;;  %v2952_v58 = vor.u32 %v3677_v48, %v2951_v47  ;;  %v3547_v59 = vld [vmem:[%s5636_s1 + $0x4c] sm:$0xf]  ;;  %v3033_v29 = vld [vmem:[%s5636_s1 + $0x4f8] sm:$0xf0]  ;;  %v2908_v31 = vor.u32 %v3663_v18, %v2905_v20 }
  0x85   :  { %1479 = vmatpush.bf16.msra.mxu1 %v3032_v49  ;;  %v2604_v49 = vor.u32 %v3587_v40, %v2601_v41  ;;  %v2537_v40 = vld [vmem:[%s5636_s1 + $0x118] sm:$0xf0] }
  0x86   :  { %1448 = vmatmul.bf16.vlgmr.msrb.gmra.mxu3 %v4175_v7  ;;  %1435 = vmatmul.bf16.vlgmr.msrb.gmra.mxu1 %v4142_v55  ;;  %v3017_v47 = vld [vmem:[%s5636_s1 + $0x4d8] sm:$0xf0] }
  0x87   :  { %1492 = vmatpush.bf16.msra.mxu3 %v3160_v54  ;;  %1461 = vmatmul.bf16.vlgmr.msra.gmra.mxu0 %v4131_v51  ;;  %v3583_v54 = vld [vmem:[%s5636_s1 + $0x16c] sm:$0xf]  ;;  %v3113_v20 = vld [vmem:[%s5636_s1 + $0x598] sm:$0xf0] }
  0x88   :  { %1473 = vmatpush.bf16.msra.mxu2 %v2792_v60  ;;  %1512 = vmatpush.bf16.msrb.mxu0 %v3176_v0  ;;  %v2441_v60 = vld [vmem:[%s5636_s1 + $0x58] sm:$0xf0]  ;;  %v2588_v0 = vor.u32 %v3583_v54, %v2585_v56  ;;  %v3655_v54 = vld [vmem:[%s5636_s1 + $0x3ac] sm:$0xf] }
  0x89   :  { %1480 = vmatpush.bf16.msra.mxu1 %v3016_v3  ;;  %v2444_v3 = vor.u32 %v3547_v59, %v2441_v60  ;;  %v2873_v56 = vld [vmem:[%s5636_s1 + $0x3b8] sm:$0xf0]  ;;  %v3723_v59 = vld [vmem:[%s5636_s1 + $0x5cc] sm:$0xf] }
  0x8a   :  { %v3145_v60 = vld [vmem:[%s5636_s1 + $0x5d8] sm:$0xf0] }
  0x8b   :  { %1493 = vmatpush.bf16.msra.mxu3 %v3144_v6  ;;  %1474 = vmatmul.bf16.vlgmr.msra.gmra.mxu2 %v4144_v57 }
  0x8c   :  { %1518 = vmatpush.bf16.msrb.mxu2 %v2524_v63  ;;  %1531 = vmatpush.bf16.msra.mxu0 %v2652_v10  ;;  %v3673_v63 = vld [vmem:[%s5636_s1 + $0x434] sm:$0xf0]  ;;  %v2919_v10 = vld [vmem:[%s5636_s1 + $0x408] sm:$0xf] }
  0x8d   :  { %1481 = vmatpush.bf16.msra.mxu1 %v3000_v16  ;;  %v2936_v6 = vor.u32 %v3673_v63, %v2935_v62  ;;  %v3631_v16 = vld [vmem:[%s5636_s1 + $0x2ec] sm:$0xf]  ;;  %v2920_v23 = vor.u32 %v3669_v12, %v2919_v10  ;;  %v3001_v63 = vld [vmem:[%s5636_s1 + $0x4b8] sm:$0xf0]  ;;  %v2732_v10 = vor.u32 %v3619_v1, %v2729_v2  ;;  %v2860_v12 = vor.u32 %v3651_v4, %v2857_v5  ;;  %v3243_v1 = vld [vmem:[%s5639_s3 + $0x70] sm:$0xf] }
  0x8e   :  { %v2780_v27 = vor.u32 %v3631_v16, %v2777_v17  ;;  %v3687_v62 = vld [vmem:[%s5636_s1 + $0x4ac] sm:$0xf]  ;;  %v3177_v4 = vld [vmem:[%s5636_s1 + $0x618] sm:$0xf0] }
  0x8f   :  { %1494 = vmatpush.bf16.msra.mxu3 %v3128_v19  ;;  %v2428_v19 = vor.u32 %v3543_v8, %v2425_v9  ;;  %v3719_v8 = vld [vmem:[%s5636_s1 + $0x5ac] sm:$0xf]  ;;  %v3129_v9 = vld [vmem:[%s5636_s1 + $0x5b8] sm:$0xf0] }
  0x90   :  { %1519 = vmatpush.bf16.msrb.mxu2 %v2508_v13  ;;  %1532 = vmatpush.bf16.msra.mxu0 %v2636_v22  ;;  %v3047_v13 = vld [vmem:[%s5636_s1 + $0x508] sm:$0xf]  ;;  %v2553_v22 = vld [vmem:[%s5636_s1 + $0x138] sm:$0xf0]  ;;  %v3647_v16 = vld [vmem:[%s5636_s1 + $0x36c] sm:$0xf] }
  0x91   :  { %1482 = vmatpush.bf16.msra.mxu1 %v2984_v28  ;;  %v3048_v26 = vor.u32 %v3701_v14, %v3047_v13  ;;  %v3695_v28 = vld [vmem:[%s5636_s1 + $0x4ec] sm:$0xf]  ;;  %v2713_v14 = vld [vmem:[%s5636_s1 + $0x278] sm:$0xf0] }
  0x92   :  { %v3036_v41 = vor.u32 %v3695_v28, %v3033_v29  ;;  %v3615_v13 = vld [vmem:[%s5636_s1 + $0x26c] sm:$0xf] }
  0x93   :  { %1495 = vmatpush.bf16.msra.mxu3 %v3112_v32  ;;  %v2556_v32 = vor.u32 %v3575_v21, %v2553_v22  ;;  %v2716_v21 = vor.u32 %v3615_v13, %v2713_v14  ;;  %v3679_v22 = vld [vmem:[%s5636_s1 + $0x46c] sm:$0xf] }
  0x94   :  { %1520 = vmatpush.bf16.msrb.mxu2 %v2492_v25  ;;  %1533 = vmatpush.bf16.msra.mxu0 %v2620_v36  ;;  %v2409_v25 = vld [vmem:[%s5636_s1 + $0x18] sm:$0xf0]  ;;  %v3659_v36 = vld [vmem:[%s5636_s1 + $0x3cc] sm:$0xf] }
  0x95   :  { %1483 = vmatpush.bf16.msra.mxu1 %v2968_v42  ;;  %v2412_v37 = vor.u32 %v3539_v24, %v2409_v25  ;;  %v3727_v42 = vld [vmem:[%s5636_s1 + $0x5ec] sm:$0xf]  ;;  %v2892_v48 = vor.u32 %v3659_v36, %v2889_v38 }
  0x96   :  { %v3611_v25 = vld [vmem:[%s5636_s1 + $0x24c] sm:$0xf] }
  0x97   :  { %1496 = vmatpush.bf16.msra.mxu3 %v3096_v46  ;;  %3183 = vmatmul.msk.bf16.vlgmr.msrb.gmra.mxu0 %vm1241_vm0, %v4254_v45  ;;  %v3691_v46 = vld [vmem:[%s5636_s1 + $0x4cc] sm:$0xf] }
  0x98   :  { %1521 = vmatpush.bf16.msrb.mxu2 %v2476_v39  ;;  %1534 = vmatpush.bf16.msra.mxu0 %v2604_v49  ;;  %v3571_v39 = vld [vmem:[%s5636_s1 + $0x10c] sm:$0xf] }
  0x99   :  { %1484 = vmatpush.bf16.msra.mxu1 %v2952_v58  ;;  %v2540_v49 = vor.u32 %v3571_v39, %v2537_v40  ;;  %v3020_v58 = vor.u32 %v3691_v46, %v3017_v47  ;;  %v3643_v29 = vld [vmem:[%s5636_s1 + $0x34c] sm:$0xf]  ;;  %v2953_v39 = vld [vmem:[%s5636_s1 + $0x458] sm:$0xf0] }
  0x9a   :  { %v3675_v38 = vld [vmem:[%s5636_s1 + $0x44c] sm:$0xf]  ;;  %v2809_v47 = vld [vmem:[%s5636_s1 + $0x338] sm:$0xf0] }
  0x9b   :  { %1497 = vmatpush.bf16.msra.mxu3 %v3080_v61  ;;  %v2748_v61 = vor.u32 %v3623_v50, %v2745_v52  ;;  %v3639_v46 = vld [vmem:[%s5636_s1 + $0x32c] sm:$0xf]  ;;  %v3081_v52 = vld [vmem:[%s5636_s1 + $0x558] sm:$0xf0] }
  0x9c   :  { %1522 = vmatpush.bf16.msrb.mxu2 %v2460_v53  ;;  %1535 = vmatpush.bf16.msra.mxu0 %v2588_v0  ;;  %v3164_v53 = vor.u32 %v3727_v42, %v3161_v43  ;;  %v2876_v0 = vor.u32 %v3655_v54, %v2873_v56  ;;  %v3607_v42 = vld [vmem:[%s5636_s1 + $0x22c] sm:$0xf]  ;;  %v2681_v43 = vld [vmem:[%s5636_s1 + $0x238] sm:$0xf0] }
  0x9d   :  { %1485 = vmatpush.bf16.msra.mxu1 %v2936_v6  ;;  %v3004_v6 = vor.u32 %v3687_v62, %v3001_v63  ;;  %v3707_v50 = vld [vmem:[%s5636_s1 + $0x54c] sm:$0xf]  ;;  %v2684_v54 = vor.u32 %v3607_v42, %v2681_v43  ;;  %v2793_v63 = vld [vmem:[%s5636_s1 + $0x318] sm:$0xf0] }
  0x9e   :  { %v3671_v56 = vld [vmem:[%s5636_s1 + $0x42c] sm:$0xf] }
  0x9f   :  { %1498 = vmatpush.bf16.msra.mxu3 %v3064_v11  ;;  %v3683_v11 = vld [vmem:[%s5636_s1 + $0x48c] sm:$0xf] }
  0xa0   :  { %1523 = vmatpush.bf16.msrb.mxu2 %v2444_v3  ;;  %1536 = vmatpush.bf16.msra.mxu0 %v2572_v15  ;;  %v3148_v3 = vor.u32 %v3723_v59, %v3145_v60  ;;  %v3132_v15 = vor.u32 %v3719_v8, %v3129_v9  ;;  %v3603_v59 = vld [vmem:[%s5636_s1 + $0x20c] sm:$0xf]  ;;  %v2812_v60 = vor.u32 %v3639_v46, %v2809_v47  ;;  %v3065_v9 = vld [vmem:[%s5636_s1 + $0x538] sm:$0xf0]  ;;  %v3283_v46 = vld [vmem:[%s5639_s3 + $0xc0] sm:$0xf] }
  0xa1   :  { %1486 = vmatpush.bf16.msra.mxu1 %v2920_v23  ;;  %v2969_v23 = vld [vmem:[%s5636_s1 + $0x478] sm:$0xf0]  ;;  %v5052_v28 = vpop.f32.mrf.mxu1  ;;  %v3635_v62 = vld [vmem:[%s5636_s1 + $0x30c] sm:$0xf] }
  0xa2   :  { %v3703_v8 = vld [vmem:[%s5636_s1 + $0x52c] sm:$0xf]  ;;  %v2796_v14 = vor.u32 %v3635_v62, %v2793_v63  ;;  %v3739_v62 = vld [vmem:[%s5639_s3 + $0x24] sm:$0xf0]  ;;  %v3267_v63 = vld [vmem:[%s5639_s3 + $0xa0] sm:$0xf] }
  0xa3   :  { %1499 = vmatpush.bf16.msra.mxu3 %v3048_v26  ;;  %v2697_v26 = vld [vmem:[%s5636_s1 + $0x258] sm:$0xf0] }
  0xa4   :  { %1524 = vmatpush.bf16.msrb.mxu2 %v2428_v19  ;;  %1537 = vmatpush.bf16.msra.mxu0 %v2556_v32  ;;  %v5032_v17 = vpop.f32.mrf.mxu0  ;;  %v3715_v19 = vld [vmem:[%s5636_s1 + $0x58c] sm:$0xf]  ;;  %v2972_v32 = vor.u32 %v3679_v22, %v2969_v23  ;;  %v3235_v22 = vld [vmem:[%s5639_s3 + $0x60] sm:$0xf]  ;;  %v3747_v23 = vld [vmem:[%s5639_s3 + $0x64] sm:$0xf0] }
  0xa5   :  { %1544 = vmatpush.bf16.msrb.mxu1 %v2780_v27  ;;  %v3116_v27 = vor.u32 %v3715_v19, %v3113_v20  ;;  %v3068_v20 = vor.u32 %v3703_v8, %v3065_v9 }
  0xa6   :  { %1487 = vmatmul.bf16.vlgmr.msra.gmra.mxu1 %v4345_v30  ;;  %1500 = vmatmul.bf16.vlgmr.msra.gmra.mxu3 %v4356_v35 }
  0xa7   :  { %1557 = vmatpush.bf16.msrb.mxu3 %v2908_v31  ;;  %v2825_v31 = vld [vmem:[%s5636_s1 + $0x358] sm:$0xf0] }
  0xa8   :  { %1525 = vmatpush.bf16.msrb.mxu2 %v2412_v37  ;;  %1538 = vmatpush.bf16.msra.mxu0 %v2540_v49  ;;  %v2700_v37 = vor.u32 %v3611_v25, %v2697_v26  ;;  %v2828_v40 = vor.u32 %v3643_v29, %v2825_v31  ;;  %v2956_v49 = vor.u32 %v3675_v38, %v2953_v39  ;;  %v3049_v25 = vld [vmem:[%s5636_s1 + $0x518] sm:$0xf0]  ;;  %v3299_v29 = vld [vmem:[%s5639_s3 + $0xe0] sm:$0xf]  ;;  %v3763_v31 = vld [vmem:[%s5639_s3 + $0xe4] sm:$0xf0] }
  0xa9   :  { %1545 = vmatpush.bf16.msrb.mxu1 %v2764_v44  ;;  %v5066_v36 = vpop.f32.mrf.mxu2  ;;  %v3100_v44 = vor.u32 %v3711_v33, %v3097_v34  ;;  %v1269_v2 = vpop.f32.mrf.mxu1  ;;  %v3745_v34 = vld [vmem:[%s5639_s3 + $0x54] sm:$0xf0]  ;;  %v3300_v38 = vor.u32 %v3763_v31, %v3299_v29 }
  0xab   :  { %1558 = vmatpush.bf16.msrb.mxu3 %v2892_v48  ;;  %1526 = vmatmul.bf16.vlgmr.msrb.gmra.mxu2 %v4142_v55  ;;  %v2985_v55 = vld [vmem:[%s5636_s1 + $0x498] sm:$0xf0] }
  0xac   :  { %1570 = vmatpush.bf16.msra.mxu2 %v3036_v41  ;;  %1583 = vmatpush.bf16.msrb.mxu0 %v3164_v53  ;;  %v2988_v18 = vor.u32 %v3683_v11, %v2985_v55  ;;  %v5074_v41 = vpop.f32.mrf.mxu3  ;;  %v1256_v48 = vpop.f32.mrf.mxu0  ;;  %v5097_v53 = vld [vmem:[%s5638_s2] sm:$0xf]  ;;  %v3667_v55 = vld [vmem:[%s5636_s1 + $0x40c] sm:$0xf] }
  0xad   :  { %1546 = vmatpush.bf16.msrb.mxu1 %v2748_v61  ;;  %1539 = vmatmul.bf16.vlgmr.msra.gmra.mxu0 %v4175_v7  ;;  %v2841_v7 = vld [vmem:[%s5636_s1 + $0x378] sm:$0xf0]  ;;  %v253_v13 = vperm.slane %v5097_v53, 0 }
  0xae   :  { %v2844_v24 = vor.u32 %v3647_v16, %v2841_v7  ;;  %v2665_v61 = vld [vmem:[%s5636_s1 + $0x218] sm:$0xf0]  ;;  %v3307_v7 = vld [vmem:[%s5639_s3 + $0xf0] sm:$0xf] }
  0xaf   :  { %1559 = vmatpush.bf16.msrb.mxu3 %v2876_v0  ;;  %v3084_v0 = vor.u32 %v3707_v50, %v3081_v52  ;;  %v2668_v11 = vor.u32 %v3603_v59, %v2665_v61  ;;  %v3203_v61 = vld [vmem:[%s5639_s3 + $0x20] sm:$0xf] }
  0xb0   :  { %1571 = vmatpush.bf16.msra.mxu2 %v3020_v58  ;;  %1584 = vmatpush.bf16.msrb.mxu0 %v3148_v3  ;;  %v2937_v58 = vld [vmem:[%s5636_s1 + $0x438] sm:$0xf0]  ;;  %v3731_v3 = vld [vmem:[%s5636_s1 + $0x60c] sm:$0xf] }
  0xb1   :  { %1547 = vmatpush.bf16.msrb.mxu1 %v2732_v10  ;;  %v2940_v5 = vor.u32 %v3671_v56, %v2937_v58  ;;  %v1282_v10 = vpop.f32.mrf.mxu2  ;;  %v3757_v58 = vld [vmem:[%s5639_s3 + $0xb4] sm:$0xf0] }
  0xb3   :  { %1560 = vmatpush.bf16.msrb.mxu3 %v2860_v12  ;;  %v2921_v12 = vld [vmem:[%s5636_s1 + $0x418] sm:$0xf0] }
  0xb4   :  { %1572 = vmatpush.bf16.msra.mxu2 %v3004_v6  ;;  %1585 = vmatpush.bf16.msrb.mxu0 %v3132_v15  ;;  %v3749_v6 = vld [vmem:[%s5639_s3 + $0x74] sm:$0xf0]  ;;  %v3180_v15 = vor.u32 %v3731_v3, %v3177_v4  ;;  %v1295_v16 = vpop.f32.mrf.mxu3  ;;  %v3195_v3 = vld [vmem:[%s5639_s3 + $0x10] sm:$0xf] }
  0xb5   :  { %1548 = vmatpush.bf16.msrb.mxu1 %v2716_v21  ;;  %v3244_v19 = vor.u32 %v3749_v6, %v3243_v1  ;;  %v2924_v21 = vor.u32 %v3667_v55, %v2921_v12  ;;  %v3204_v1 = vor.u32 %v3739_v62, %v3203_v61  ;;  %v3737_v4 = vld [vmem:[%s5639_s3 + $0x14] sm:$0xf0]  ;;  %v3245_v16 = vld [vmem:[%s5639_s3 + $0x78] sm:$0xf0] }
  0xb6   :  { %v3196_v55 = vor.u32 %v3737_v4, %v3195_v3  ;;  %v3777_v3 = vld [vmem:[%s5639_s3 + $0x154] sm:$0xf0]  ;;  %v3738_v4 = vld [vmem:[%s5639_s3 + $0x24] sm:$0xf] }
  0xb7   :  { %1561 = vmatpush.bf16.msrb.mxu3 %v2844_v24  ;;  %v3699_v24 = vld [vmem:[%s5636_s1 + $0x50c] sm:$0xf] }
  0xb8   :  { %1573 = vmatpush.bf16.msra.mxu2 %v2988_v18  ;;  %1586 = vmatpush.bf16.msrb.mxu0 %v3116_v27  ;;  %v3765_v18 = vld [vmem:[%s5639_s3 + $0xf4] sm:$0xf0]  ;;  %v1255_v27 = vadd.f32 %v5032_v17, %v253_v13  ;;  %v3052_v33 = vor.u32 %v3699_v24, %v3049_v25  ;;  %v3227_v17 = vld [vmem:[%s5639_s3 + $0x50] sm:$0xf]  ;;  %v3187_v13 = vld [vmem:[%s5639_s3] sm:$0xf] }
  0xb9   :  { %1549 = vmatpush.bf16.msrb.mxu1 %v2700_v37  ;;  %v3308_v26 = vor.u32 %v3765_v18, %v3307_v7  ;;  %v1332_v37 = vpop.f32.mrf.mxu2  ;;  %v3228_v42 = vor.u32 %v3745_v34, %v3227_v17  ;;  %v3251_v18 = vld [vmem:[%s5639_s3 + $0x80] sm:$0xf]  ;;  %v3762_v17 = vld [vmem:[%s5639_s3 + $0xe4] sm:$0xf]  ;;  %v3301_v34 = vld [vmem:[%s5639_s3 + $0xe8] sm:$0xf0] }
  0xba   :  { %v1268_v39 = vadd.f32 %v5052_v28, %v1255_v27  ;;  %v3743_v28 = vld [vmem:[%s5639_s3 + $0x44] sm:$0xf0]  ;;  %v3237_v27 = vld [vmem:[%s5639_s3 + $0x68] sm:$0xf0] }
  0xbb   :  { %1562 = vmatpush.bf16.msrb.mxu3 %v2828_v40  ;;  %v3761_v40 = vld [vmem:[%s5639_s3 + $0xd4] sm:$0xf0] }
  0xbc   :  { %1574 = vmatpush.bf16.msra.mxu2 %v2972_v32  ;;  %1587 = vmatpush.bf16.msrb.mxu0 %v3100_v44  ;;  %v3236_v32 = vor.u32 %v3747_v23, %v3235_v22  ;;  %v1281_v44 = vadd.f32 %v5066_v36, %v1268_v39  ;;  %v3741_v36 = vld [vmem:[%s5639_s3 + $0x34] sm:$0xf0]  ;;  %v3309_v22 = vld [vmem:[%s5639_s3 + $0xf8] sm:$0xf0]  ;;  %v3744_v39 = vld [vmem:[%s5639_s3 + $0x54] sm:$0xf] }
  0xbd   :  { %1550 = vmatpush.bf16.msrb.mxu1 %v2684_v54 }
  0xbe   :  { %v1294_v56 = vadd.f32 %v5074_v41, %v1281_v44  ;;  %v3781_v44 = vld [vmem:[%s5639_s3 + $0x174] sm:$0xf0] }
  0xbf   :  { %1563 = vmatpush.bf16.msrb.mxu3 %v2812_v60 }
  0xc0   :  { %1575 = vmatpush.bf16.msra.mxu2 %v2956_v49  ;;  %1588 = vmatpush.bf16.msrb.mxu0 %v3084_v0  ;;  %v1306_v48 = vpop.f32.mrf.mxu0  ;;  %v3211_v49 = vld [vmem:[%s5639_s3 + $0x30] sm:$0xf]  ;;  %v3755_v0 = vld [vmem:[%s5639_s3 + $0xa4] sm:$0xf0] }
  0xc1   :  { %1551 = vmatpush.bf16.msrb.mxu1 %v2668_v11  ;;  %v1334_v52 = vpop.f32.mrf.mxu2  ;;  %v3212_v59 = vor.u32 %v3741_v36, %v3211_v49  ;;  %v1307_v60 = vadd.f32 %v1306_v48, %v1294_v56  ;;  %v3268_v9 = vor.u32 %v3755_v0, %v3267_v63  ;;  %v3259_v11 = vld [vmem:[%s5639_s3 + $0x90] sm:$0xf]  ;;  %v3221_v48 = vld [vmem:[%s5639_s3 + $0x48] sm:$0xf0]  ;;  %v3740_v56 = vld [vmem:[%s5639_s3 + $0x34] sm:$0xf] }
  0xc2   :  { %v3285_v52 = vld [vmem:[%s5639_s3 + $0xc8] sm:$0xf0]  ;;  %v3756_v63 = vld [vmem:[%s5639_s3 + $0xb4] sm:$0xf]  ;;  %v3277_v0 = vld [vmem:[%s5639_s3 + $0xb8] sm:$0xf0] }
  0xc3   :  { %1564 = vmatpush.bf16.msrb.mxu3 %v2796_v14  ;;  %v1319_v50 = vpop.f32.mrf.mxu1  ;;  %v3735_v14 = vld [vmem:[%s5639_s3 + $0x4] sm:$0xf0] }
  0xc4   :  { %1576 = vmatpush.bf16.msra.mxu2 %v2940_v5  ;;  %1589 = vmatpush.bf16.msrb.mxu0 %v3068_v20  ;;  %v1320_v2 = vadd.f32 %v1319_v50, %v1307_v60  ;;  %v3188_v20 = vor.u32 %v3735_v14, %v3187_v13  ;;  %v3758_v50 = vld [vmem:[%s5639_s3 + $0xc4] sm:$0xf]  ;;  %v3197_v13 = vld [vmem:[%s5639_s3 + $0x18] sm:$0xf0]  ;;  %v3347_v14 = vld [vmem:[%s5639_s3 + $0x140] sm:$0xf] }
  0xc5   :  { %1603 = vmatpush.bf16.msra.mxu1 %v3180_v15  ;;  %v3748_v15 = vld [vmem:[%s5639_s3 + $0x74] sm:$0xf]  ;;  %v3288_v61 = vor.u32 %v3758_v50, %v3285_v52  ;;  %v3767_v50 = vld [vmem:[%s5639_s3 + $0x104] sm:$0xf0] }
  0xc6   :  { %1552 = vmatmul.bf16.vlgmr.msrb.gmra.mxu1 %v4131_v51  ;;  %1565 = vmatmul.bf16.vlgmr.msrb.gmra.mxu3 %v4144_v57  ;;  %v3291_v51 = vld [vmem:[%s5639_s3 + $0xd0] sm:$0xf]  ;;  %v3219_v57 = vld [vmem:[%s5639_s3 + $0x40] sm:$0xf]  ;;  %v1333_v12 = vadd.f32 %v1332_v37, %v1320_v2  ;;  %v3248_v24 = vor.u32 %v3748_v15, %v3245_v16  ;;  %v3775_v15 = vld [vmem:[%s5639_s3 + $0x144] sm:$0xf0] }
  0xc7   :  { %2007 = vmatpush.bf16.msra.mxu3 %v3244_v19  ;;  %v3292_v43 = vor.u32 %v3761_v40, %v3291_v51  ;;  %v3220_v47 = vor.u32 %v3743_v28, %v3219_v57  ;;  %v3751_v19 = vld [vmem:[%s5639_s3 + $0x84] sm:$0xf0]  ;;  %v3229_v51 = vld [vmem:[%s5639_s3 + $0x58] sm:$0xf0]  ;;  %v3304_v40 = vor.u32 %v3762_v17, %v3301_v34  ;;  %v3760_v28 = vld [vmem:[%s5639_s3 + $0xd4] sm:$0xf] }
  0xc8   :  { %1577 = vmatpush.bf16.msra.mxu2 %v2924_v21  ;;  %1590 = vmatpush.bf16.msrb.mxu0 %v3052_v33  ;;  %v1308_v5 = vpop.f32.mrf.mxu0  ;;  %v3764_v21 = vld [vmem:[%s5639_s3 + $0xf4] sm:$0xf]  ;;  %v1609_v23 = vmax.f32 %v1333_v12, 0.0  ;;  %v3252_v29 = vor.u32 %v3751_v19, %v3251_v18  ;;  %v254_v33 = vperm.slane %v5097_v53, 1  ;;  %v3355_v2 = vld [vmem:[%s5639_s3 + $0x150] sm:$0xf]  ;;  %v3348_v19 = vor.u32 %v3775_v15, %v3347_v14 }
  0xc9   :  { %2020 = vmatpush.bf16.msrb.mxu1 %v3308_v26  ;;  %v1345_v6 = vpop.f32.mrf.mxu3  ;;  %v3746_v26 = vld [vmem:[%s5639_s3 + $0x64] sm:$0xf]  ;;  %v3205_v5 = vld [vmem:[%s5639_s3 + $0x28] sm:$0xf0]  ;;  %v3736_v12 = vld [vmem:[%s5639_s3 + $0x14] sm:$0xf] }
  0xca   :  { %v5273_v37 = vpack.c.bf16 %v1609_v23, %v1609_v23  ;;  %v1346_v57 = vadd.f32 %v1345_v6, %v254_v33  ;;  %v3356_v6 = vor.u32 %v3777_v3, %v3355_v2  ;;  %v3261_v23 = vld [vmem:[%s5639_s3 + $0x98] sm:$0xf0]  ;;  %v3771_v33 = vld [vmem:[%s5639_s3 + $0x124] sm:$0xf0]  ;;  %v3772_v14 = vld [vmem:[%s5639_s3 + $0x134] sm:$0xf] }
  0xcb   :  { %2008 = vmatpush.bf16.msra.mxu3 %v3236_v32  ;;  %1578 = vmatmul.bf16.vlgmr.msra.gmra.mxu2 %v4345_v30  ;;  %v3759_v30 = vld [vmem:[%s5639_s3 + $0xc4] sm:$0xf0]  ;;  %v1321_v8 = vpop.f32.mrf.mxu1  ;;  %v3312_v32 = vor.u32 %v3764_v21, %v3309_v22  ;;  %v3752_v22 = vld [vmem:[%s5639_s3 + $0x94] sm:$0xf]  ;;  %v3357_v3 = vld [vmem:[%s5639_s3 + $0x158] sm:$0xf0] }
  0xcc   :  { %1591 = vmatmul.bf16.vlgmr.msrb.gmra.mxu0 %v4356_v35  ;;  %v3284_v54 = vor.u32 %v3759_v30, %v3283_v46  ;;  %v3275_v35 = vld [vmem:[%s5639_s3 + $0xb0] sm:$0xf]  ;;  %v3232_v46 = vor.u32 %v3744_v39, %v3229_v51  ;;  %v3264_v34 = vor.u32 %v3752_v22, %v3261_v23  ;;  %v3750_v39 = vld [vmem:[%s5639_s3 + $0x84] sm:$0xf]  ;;  %v3253_v51 = vld [vmem:[%s5639_s3 + $0x88] sm:$0xf0] }
  0xcd   :  { %2021 = vmatpush.bf16.msrb.mxu1 %v3300_v38  ;;  %v3276_v41 = vor.u32 %v3757_v58, %v3275_v35  ;;  %v3240_v38 = vor.u32 %v3746_v26, %v3237_v27  ;;  %v3213_v35 = vld [vmem:[%s5639_s3 + $0x38] sm:$0xf0]  ;;  %v3363_v58 = vld [vmem:[%s5639_s3 + $0x160] sm:$0xf]  ;;  %v3339_v26 = vld [vmem:[%s5639_s3 + $0x130] sm:$0xf] }
  0xce   :  { %v1358_v10 = vpop.f32.mrf.mxu2  ;;  %v3773_v27 = vld [vmem:[%s5639_s3 + $0x134] sm:$0xf0]  ;;  %v3770_v23 = vld [vmem:[%s5639_s3 + $0x124] sm:$0xf] }
  0xcf   :  { %2009 = vmatpush.bf16.msra.mxu3 %v3228_v42  ;;  %v3371_v42 = vld [vmem:[%s5639_s3 + $0x170] sm:$0xf]  ;;  %v1359_v36 = vadd.f32 %v1358_v10, %v1346_v57 }
  0xd0   :  { %v3372_v30 = vor.u32 %v3781_v44, %v3371_v42  ;;  %v3323_v57 = vld [vmem:[%s5639_s3 + $0x110] sm:$0xf] }
  0xd1   :  { %2022 = vmatpush.bf16.msrb.mxu1 %v3292_v43  ;;  %v1347_v25 = vpop.f32.mrf.mxu3  ;;  %v3293_v43 = vld [vmem:[%s5639_s3 + $0xd8] sm:$0xf0] }
  0xd2   :  { %v3296_v49 = vor.u32 %v3760_v28, %v3293_v43  ;;  %2033 = vmatpush.bf16.msrb.mxu2 %v3372_v30  ;;  %v3734_v25 = vld [vmem:[%s5639_s3 + $0x4] sm:$0xf]  ;;  %v3769_v28 = vld [vmem:[%s5639_s3 + $0x114] sm:$0xf0] }
  0xd3   :  { %2010 = vmatpush.bf16.msra.mxu3 %v3220_v47  ;;  %v3742_v47 = vld [vmem:[%s5639_s3 + $0x44] sm:$0xf] }
  0xd5   :  { %2023 = vmatpush.bf16.msrb.mxu1 %v3284_v54  ;;  %v3224_v54 = vor.u32 %v3742_v47, %v3221_v48  ;;  %v3324_v48 = vor.u32 %v3769_v28, %v3323_v57  ;;  %v3317_v57 = vld [vmem:[%s5639_s3 + $0x108] sm:$0xf0] }
  0xd6   :  { %3184 = vmatmul.msk.bf16.vlgmr.msra.gmra.mxu1 %vm1241_vm0, %v4254_v45  ;;  %v3753_v45 = vld [vmem:[%s5639_s3 + $0x94] sm:$0xf0]  ;;  %v1360_v31 = vpop.f32.mrf.mxu2 }
  0xd7   :  { %2011 = vmatpush.bf16.msra.mxu3 %v3212_v59  ;;  %v3260_v7 = vor.u32 %v3753_v45, %v3259_v11  ;;  %v3779_v59 = vld [vmem:[%s5639_s3 + $0x164] sm:$0xf0]  ;;  %v3754_v11 = vld [vmem:[%s5639_s3 + $0xa4] sm:$0xf]  ;;  %v3269_v45 = vld [vmem:[%s5639_s3 + $0xa8] sm:$0xf0]  ;;  %v3340_v31 = vor.u32 %v3773_v27, %v3339_v26 }
  0xd8   :  { %v3364_v62 = vor.u32 %v3779_v59, %v3363_v58  ;;  %v3272_v18 = vor.u32 %v3754_v11, %v3269_v45  ;;  %v3373_v58 = vld [vmem:[%s5639_s3 + $0x178] sm:$0xf0]  ;;  %v3349_v11 = vld [vmem:[%s5639_s3 + $0x148] sm:$0xf0]  ;;  %v3403_v26 = vld [vmem:[%s5639_s3 + $0x1b0] sm:$0xf] }
  0xd9   :  { %2024 = vmatpush.bf16.msrb.mxu1 %v3276_v41  ;;  %v3789_v27 = vld [vmem:[%s5639_s3 + $0x1b4] sm:$0xf0] }
  0xda   :  { %2034 = vmatpush.bf16.msrb.mxu2 %v3364_v62 }
  0xdb   :  { %2012 = vmatpush.bf16.msra.mxu3 %v3204_v1  ;;  %v3216_v1 = vor.u32 %v3740_v56, %v3213_v35  ;;  %v3780_v35 = vld [vmem:[%s5639_s3 + $0x174] sm:$0xf] }
  0xdc   :  { %v3376_v59 = vor.u32 %v3780_v35, %v3373_v58  ;;  %v3796_v35 = vld [vmem:[%s5639_s3 + $0x1f4] sm:$0xf]  ;;  %v3437_v58 = vld [vmem:[%s5639_s3 + $0x1f8] sm:$0xf0] }
  0xdd   :  { %2025 = vmatpush.bf16.msrb.mxu1 %v3268_v9  ;;  %v3280_v9 = vor.u32 %v3756_v63, %v3277_v0  ;;  %v3797_v63 = vld [vmem:[%s5639_s3 + $0x1f4] sm:$0xf0]  ;;  %v3776_v0 = vld [vmem:[%s5639_s3 + $0x154] sm:$0xf] }
  0xde   :  { %2035 = vmatpush.bf16.msrb.mxu2 %v3356_v6  ;;  %v3795_v6 = vld [vmem:[%s5639_s3 + $0x1e4] sm:$0xf0] }
  0xdf   :  { %2013 = vmatpush.bf16.msra.mxu3 %v3196_v55  ;;  %v3208_v55 = vor.u32 %v3738_v4, %v3205_v5  ;;  %v3360_v4 = vor.u32 %v3776_v0, %v3357_v3  ;;  %v3427_v5 = vld [vmem:[%s5639_s3 + $0x1e0] sm:$0xf] }
  0xe0   :  { %v1371_v60 = vpop.f32.mrf.mxu0 }
  0xe1   :  { %2026 = vmatpush.bf16.msrb.mxu1 %v3260_v7  ;;  %v1372_v41 = vadd.f32 %v1371_v60, %v1359_v36  ;;  %v3315_v36 = vld [vmem:[%s5639_s3 + $0x100] sm:$0xf]  ;;  %v3778_v60 = vld [vmem:[%s5639_s3 + $0x164] sm:$0xf] }
  0xe2   :  { %2036 = vmatpush.bf16.msrb.mxu2 %v3348_v19 }
  0xe3   :  { %2014 = vmatpush.bf16.msra.mxu3 %v3188_v20  ;;  %v1384_v8 = vpop.f32.mrf.mxu1 }
  0xe4   :  { %v1385_v10 = vadd.f32 %v1384_v8, %v1372_v41  ;;  %v3435_v41 = vld [vmem:[%s5639_s3 + $0x1f0] sm:$0xf]  ;;  %v3774_v8 = vld [vmem:[%s5639_s3 + $0x144] sm:$0xf] }
  0xe5   :  { %2027 = vmatpush.bf16.msrb.mxu1 %v3252_v29  ;;  %v3189_v29 = vld [vmem:[%s5639_s3 + $0x8] sm:$0xf0]  ;;  %v3436_v2 = vor.u32 %v3797_v63, %v3435_v41  ;;  %v3352_v45 = vor.u32 %v3774_v8, %v3349_v11  ;;  %v3794_v41 = vld [vmem:[%s5639_s3 + $0x1e4] sm:$0xf] }
  0xe6   :  { %2015 = vmatmul.bf16.vlgmr.msra.gmra.mxu3 %v5273_v37  ;;  %2037 = vmatpush.bf16.msrb.mxu2 %v3340_v31  ;;  %v3768_v31 = vld [vmem:[%s5639_s3 + $0x114] sm:$0xf]  ;;  %v3429_v63 = vld [vmem:[%s5639_s3 + $0x1e8] sm:$0xf0] }
  0xe7   :  { %2059 = vmatpush.bf16.msrb.mxu3 %v3248_v24  ;;  %v3200_v24 = vor.u32 %v3736_v12, %v3197_v13  ;;  %2046 = vmatpush.bf16.msra.mxu0 %v3436_v2  ;;  %v3419_v12 = vld [vmem:[%s5639_s3 + $0x1d0] sm:$0xf]  ;;  %v3793_v13 = vld [vmem:[%s5639_s3 + $0x1d4] sm:$0xf0]  ;;  %v3432_v2 = vor.u32 %v3794_v41, %v3429_v63 }
  0xe8   :  { %v1373_v16 = vpop.f32.mrf.mxu0  ;;  %v3805_v63 = vld [vmem:[%s5642_s5 + $0x38] sm:$0xff] }
  0xe9   :  { %2072 = vmatpush.bf16.msra.mxu1 %v3312_v32  ;;  %v1397_v7 = vpop.f32.mrf.mxu3  ;;  %v3331_v32 = vld [vmem:[%s5639_s3 + $0x120] sm:$0xf] }
  0xea   :  { %v1398_v20 = vadd.f32 %v1397_v7, %v1385_v10  ;;  %v3332_v42 = vor.u32 %v3771_v33, %v3331_v32  ;;  %v3428_v10 = vor.u32 %v3795_v6, %v3427_v5  ;;  %v3420_v7 = vor.u32 %v3793_v13, %v3419_v12  ;;  %v3325_v32 = vld [vmem:[%s5639_s3 + $0x118] sm:$0xf0]  ;;  %v3792_v5 = vld [vmem:[%s5639_s3 + $0x1d4] sm:$0xf]  ;;  %v3413_v12 = vld [vmem:[%s5639_s3 + $0x1c8] sm:$0xf0] }
  0xeb   :  { %2060 = vmatpush.bf16.msrb.mxu3 %v3240_v38  ;;  %v1386_v17 = vpop.f32.mrf.mxu1  ;;  %v255_v33 = vperm.slane %v5097_v53, 2  ;;  %v3421_v6 = vld [vmem:[%s5639_s3 + $0x1d8] sm:$0xf0] }
  0xec   :  { %2038 = vmatpush.bf16.msrb.mxu2 %v3332_v42  ;;  %2047 = vmatpush.bf16.msra.mxu0 %v3428_v10  ;;  %v3404_v17 = vor.u32 %v3789_v27, %v3403_v26  ;;  %v3766_v42 = vld [vmem:[%s5639_s3 + $0x104] sm:$0xf] }
  0xed   :  { %2073 = vmatpush.bf16.msra.mxu1 %v3304_v40  ;;  %v3192_v40 = vor.u32 %v3734_v25, %v3189_v29 }
  0xee   :  { %v1410_v21 = vpop.f32.mrf.mxu2 }
  0xef   :  { %2061 = vmatpush.bf16.msrb.mxu3 %v3232_v46  ;;  %v1411_v38 = vadd.f32 %v1410_v21, %v1398_v20  ;;  %v3256_v46 = vor.u32 %v3750_v39, %v3253_v51  ;;  %v3411_v20 = vld [vmem:[%s5639_s3 + $0x1c0] sm:$0xf]  ;;  %v3791_v21 = vld [vmem:[%s5639_s3 + $0x1c4] sm:$0xf0] }
  0xf0   :  { %v1423_v43 = vpop.f32.mrf.mxu0  ;;  %2039 = vmatpush.bf16.msrb.mxu2 %v3324_v48  ;;  %2048 = vmatpush.bf16.msra.mxu0 %v3420_v7  ;;  %v3412_v22 = vor.u32 %v3791_v21, %v3411_v20  ;;  %v3395_v39 = vld [vmem:[%s5639_s3 + $0x1a0] sm:$0xf]  ;;  %v3787_v51 = vld [vmem:[%s5639_s3 + $0x1a4] sm:$0xf0]  ;;  %v3785_v48 = vld [vmem:[%s5639_s3 + $0x194] sm:$0xf0] }
  0xf1   :  { %2074 = vmatpush.bf16.msra.mxu1 %v3296_v49  ;;  %v1399_v44 = vpop.f32.mrf.mxu3  ;;  %v1424_v30 = vadd.f32 %v1423_v43, %v1411_v38  ;;  %v3328_v38 = vor.u32 %v3768_v31, %v3325_v32  ;;  %v3396_v43 = vor.u32 %v3787_v51, %v3395_v39  ;;  %v256_v21 = vperm.slane %v5097_v53, 3  ;;  %v3381_v53 = vld [vmem:[%s5639_s3 + $0x188] sm:$0xf0] }
  0xf2   :  { %v3320_v44 = vor.u32 %v3766_v42, %v3317_v57 }
  0xf3   :  { %2062 = vmatpush.bf16.msrb.mxu3 %v3224_v54  ;;  %v1610_v49 = vmax.f32 %v1424_v30, 0.0  ;;  %v3316_v54 = vor.u32 %v3767_v50, %v3315_v36 }
  0xf4   :  { %2049 = vmatpush.bf16.msra.mxu0 %v3412_v22  ;;  %v3784_v22 = vld [vmem:[%s5639_s3 + $0x194] sm:$0xf] }
  0xf5   :  { %2075 = vmatpush.bf16.msra.mxu1 %v3288_v61  ;;  %v1614_v52 = vpack.c.bf16 %v1610_v49, %v1610_v49  ;;  %2040 = vmatpush.bf16.msrb.mxu2 %v3316_v54  ;;  %v3783_v54 = vld [vmem:[%s5639_s3 + $0x184] sm:$0xf0] }
  0xf6   :  { %v1412_v47 = vpop.f32.mrf.mxu2 }
  0xf7   :  { %2063 = vmatpush.bf16.msrb.mxu3 %v3216_v1  ;;  %2028 = vmatmul.bf16.vlgmr.msrb.gmra.mxu1 %v1614_v52  ;;  %v3387_v47 = vld [vmem:[%s5639_s3 + $0x190] sm:$0xf] }
  0xf8   :  { %v1425_v56 = vpop.f32.mrf.mxu0  ;;  %2050 = vmatpush.bf16.msra.mxu0 %v3404_v17  ;;  %v3388_v49 = vor.u32 %v3785_v48, %v3387_v47 }
  0xf9   :  { %2076 = vmatpush.bf16.msra.mxu1 %v3280_v9  ;;  %2085 = vmatpush.bf16.msra.mxu2 %v3376_v59 }
  0xfb   :  { %2064 = vmatpush.bf16.msrb.mxu3 %v3208_v55 }
  0xfc   :  { %2051 = vmatpush.bf16.msra.mxu0 %v3396_v43 }
  0xfd   :  { %2077 = vmatpush.bf16.msra.mxu1 %v3272_v18  ;;  %v3341_v18 = vld [vmem:[%s5639_s3 + $0x138] sm:$0xf0] }
  0xfe   :  { %v3344_v19 = vor.u32 %v3772_v14, %v3341_v18  ;;  %v3786_v18 = vld [vmem:[%s5639_s3 + $0x1a4] sm:$0xf] }
  0xff   :  { %2065 = vmatpush.bf16.msrb.mxu3 %v3200_v24  ;;  %v3333_v24 = vld [vmem:[%s5639_s3 + $0x128] sm:$0xf0] }
 0x100   :  { %v3336_v25 = vor.u32 %v3770_v23, %v3333_v24  ;;  %2052 = vmatpush.bf16.msra.mxu0 %v3388_v49  ;;  %v3389_v23 = vld [vmem:[%s5639_s3 + $0x198] sm:$0xf0] }
 0x101   :  { %2078 = vmatpush.bf16.msra.mxu1 %v3264_v34  ;;  %v3392_v24 = vor.u32 %v3784_v22, %v3389_v23 }
 0x103   :  { %2066 = vmatpush.bf16.msrb.mxu3 %v3192_v40  ;;  %v1436_v1 = vpop.f32.mrf.mxu1 }
 0x104   :  { %v5409_v62 = vpop.f32.mrf.mxu0  ;;  %v1437_v28 = vadd.f32 %v1436_v1, %v255_v33 }
 0x105   :  { %2079 = vmatpush.bf16.msra.mxu1 %v3256_v46 }
 0x106   :  { %2067 = vmatmul.bf16.vlgmr.msrb.gmra.mxu3 %v5273_v37  ;;  %v3365_v37 = vld [vmem:[%s5639_s3 + $0x168] sm:$0xf0] }
 0x107   :  { %v3368_v61 = vor.u32 %v3778_v60, %v3365_v37  ;;  %v3440_v60 = vor.u32 %v3796_v35, %v3437_v58  ;;  %2247 = vmatpush.bf16.msra.mxu3 %v3805_v63 }
 0x108   :  { %2080 = vmatmul.bf16.vlgmr.msra.gmra.mxu1 %v1614_v52  ;;  %v3379_v52 = vld [vmem:[%s5639_s3 + $0x180] sm:$0xf] }
 0x109   :  { %2086 = vmatpush.bf16.msra.mxu2 %v3368_v61  ;;  %v1449_v9 = vpop.f32.mrf.mxu3  ;;  %v3380_v56 = vor.u32 %v3783_v54, %v3379_v52 }
 0x10a   :  { %v1450_v46 = vadd.f32 %v1449_v9, %v1437_v28  ;;  %v3424_v9 = vor.u32 %v3792_v5, %v3421_v6  ;;  %v3800_v5 = vld [vmem:[%s5642_s5 + $0x10] sm:$0xff] }
 0x10b   :  { %v1438_v16 = vpop.f32.mrf.mxu1  ;;  %2053 = vmatpush.bf16.msra.mxu0 %v3380_v56  ;;  %v3812_v6 = vld [vmem:[%s5642_s5 + $0x70] sm:$0xff] }
 0x10c   :  { %v1464_v55 = vpop.f32.mrf.mxu0  ;;  %v1463_v36 = vadd.f32 %v5409_v62, %v1450_v46  ;;  %v3405_v16 = vld [vmem:[%s5639_s3 + $0x1b8] sm:$0xf0] }
 0x10d   :  { %2087 = vmatpush.bf16.msra.mxu2 %v3360_v4  ;;  %v3790_v55 = vld [vmem:[%s5639_s3 + $0x1c4] sm:$0xf] }
 0x10e   :  { %v1475_v15 = vpop.f32.mrf.mxu2  ;;  %v3416_v13 = vor.u32 %v3790_v55, %v3413_v12  ;;  %v3809_v55 = vld [vmem:[%s5642_s5 + $0x58] sm:$0xff]  ;;  %v3808_v12 = vld [vmem:[%s5642_s5 + $0x50] sm:$0xff] }
 0x10f   :  { %v1476_v59 = vadd.f32 %v1475_v15, %v1463_v36  ;;  %2098 = vmatpush.bf16.msrb.mxu0 %v3440_v60  ;;  %v3788_v15 = vld [vmem:[%s5639_s3 + $0x1b4] sm:$0xf]  ;;  %v1681_v36 = vld [vmem:[%s5641_s4] sm:$0x3] }
 0x110   :  { %v3408_v7 = vor.u32 %v3788_v15, %v3405_v16  ;;  %v3806_v16 = vld [vmem:[%s5642_s5 + $0x40] sm:$0xff] }
 0x111   :  { %2088 = vmatpush.bf16.msra.mxu2 %v3352_v45  ;;  %v1451_v29 = vpop.f32.mrf.mxu3 }
 0x112   :  { %v3782_v29 = vld [vmem:[%s5639_s3 + $0x184] sm:$0xf] }
 0x113   :  { %2099 = vmatpush.bf16.msrb.mxu0 %v3432_v2  ;;  %v3384_v31 = vor.u32 %v3782_v29, %v3381_v53  ;;  %v3802_v2 = vld [vmem:[%s5642_s5 + $0x20] sm:$0xff] }
 0x114   :  { %v1514_v34 = vpop.f32.mrf.mxu0 }
 0x115   :  { %2089 = vmatpush.bf16.msra.mxu2 %v3344_v19  ;;  %v3397_v19 = vld [vmem:[%s5639_s3 + $0x1a8] sm:$0xf0] }
 0x116   :  { %v1477_v40 = vpop.f32.mrf.mxu2  ;;  %v3400_v20 = vor.u32 %v3786_v18, %v3397_v19  ;;  %v3820_v19 = vld [vmem:[%s5643_s7 + $0x30] sm:$0xff] }
 0x117   :  { %2100 = vmatpush.bf16.msrb.mxu0 %v3424_v9  ;;  %v3811_v9 = vld [vmem:[%s5642_s5 + $0x68] sm:$0xff] }
 0x119   :  { %2090 = vmatpush.bf16.msra.mxu2 %v3336_v25 }
 0x11b   :  { %2101 = vmatpush.bf16.msrb.mxu0 %v3416_v13 }
 0x11c   :  { %v1516_v30 = vpop.f32.mrf.mxu0 }
 0x11d   :  { %2091 = vmatpush.bf16.msra.mxu2 %v3328_v38 }
 0x11f   :  { %2102 = vmatpush.bf16.msrb.mxu0 %v3408_v7  ;;  %v3821_v7 = vld [vmem:[%s5643_s7 + $0x38] sm:$0xff] }
 0x121   :  { %2092 = vmatpush.bf16.msra.mxu2 %v3320_v44 }
 0x123   :  { %v1488_v50 = vpop.f32.mrf.mxu1  ;;  %2103 = vmatpush.bf16.msrb.mxu0 %v3400_v20  ;;  %v3819_v20 = vld [vmem:[%s5643_s7 + $0x28] sm:$0xff] }
 0x124   :  { %v1489_v37 = vadd.f32 %v1488_v50, %v1476_v59  ;;  %v1683_v50 = vperm.slane %v1681_v36, 0  ;;  %v1684_v59 = vperm.slane %v1681_v36, 1 }
 0x127   :  { %2104 = vmatpush.bf16.msrb.mxu0 %v3392_v24  ;;  %v3818_v24 = vld [vmem:[%s5643_s7 + $0x20] sm:$0xff] }
 0x129   :  { %v1501_v62 = vpop.f32.mrf.mxu3 }
 0x12a   :  { %v1540_v61 = vpop.f32.mrf.mxu0  ;;  %v1502_v0 = vadd.f32 %v1501_v62, %v1489_v37 }
 0x12b   :  { %v1490_v1 = vpop.f32.mrf.mxu1  ;;  %2105 = vmatpush.bf16.msrb.mxu0 %v3384_v31 }
 0x12c   :  { %v1515_v3 = vadd.f32 %v1514_v34, %v1502_v0  ;;  %v3804_v0 = vld [vmem:[%s5642_s5 + $0x30] sm:$0xff]  ;;  %v3803_v1 = vld [vmem:[%s5642_s5 + $0x28] sm:$0xff] }
 0x12d   :  { %2248 = vmatpush.bf16.msra.mxu3 %v3804_v0 }
 0x12e   :  { %v1527_v4 = vpop.f32.mrf.mxu2  ;;  %v1611_v8 = vmax.f32 %v1515_v3, 0.0  ;;  %v3813_v3 = vld [vmem:[%s5642_s5 + $0x78] sm:$0xff] }
 0x12f   :  { %v1528_v25 = vadd.f32 %v1527_v4, %v256_v21  ;;  %v3801_v4 = vld [vmem:[%s5642_s5 + $0x18] sm:$0xff]  ;;  %2260 = vmatpush.bf16.msrb.mxu1 %v3813_v3 }
 0x130   :  { %v1615_v10 = vpack.c.bf16 %v1611_v8, %v1611_v8  ;;  %v3799_v8 = vld [vmem:[%s5642_s5 + $0x8] sm:$0xff] }
 0x131   :  { %v1503_v45 = vpop.f32.mrf.mxu3  ;;  %v1541_v27 = vadd.f32 %v1540_v61, %v1528_v25  ;;  %2249 = vmatpush.bf16.msra.mxu3 %v3803_v1 }
 0x132   :  { %v1542_v11 = vpop.f32.mrf.mxu0  ;;  %2041 = vmatmul.bf16.vlgmr.msrb.gmra.mxu2 %v1615_v10  ;;  %v3810_v45 = vld [vmem:[%s5642_s5 + $0x60] sm:$0xff] }
 0x133   :  { %2261 = vmatpush.bf16.msrb.mxu1 %v3812_v6  ;;  %v3798_v11 = vld [vmem:[%s5642_s5] sm:$0xff]  ;;  %2343 = vmatpush.bf16.msrb.mxu2 %v3821_v7 }
 0x135   :  { %2250 = vmatpush.bf16.msra.mxu3 %v3802_v2 }
 0x136   :  { %v1529_v14 = vpop.f32.mrf.mxu2 }
 0x137   :  { %2262 = vmatpush.bf16.msrb.mxu1 %v3811_v9  ;;  %v3807_v14 = vld [vmem:[%s5642_s5 + $0x48] sm:$0xff]  ;;  %2344 = vmatpush.bf16.msrb.mxu2 %v3820_v19 }
 0x139   :  { %2251 = vmatpush.bf16.msra.mxu3 %v3801_v4 }
 0x13b   :  { %2263 = vmatpush.bf16.msrb.mxu1 %v3810_v45  ;;  %2345 = vmatpush.bf16.msrb.mxu2 %v3819_v20 }
 0x13d   :  { %2252 = vmatpush.bf16.msra.mxu3 %v3800_v5 }
 0x13f   :  { %2264 = vmatpush.bf16.msrb.mxu1 %v3809_v55  ;;  %2346 = vmatpush.bf16.msrb.mxu2 %v3818_v24 }
 0x141   :  { %2253 = vmatpush.bf16.msra.mxu3 %v3799_v8 }
 0x142   :  { %2093 = vmatmul.bf16.vlgmr.msra.gmra.mxu2 %v1615_v10 }
 0x143   :  { %v1553_v26 = vpop.f32.mrf.mxu1  ;;  %2265 = vmatpush.bf16.msrb.mxu1 %v3808_v12 }
 0x144   :  { %v1554_v32 = vadd.f32 %v1553_v26, %v1541_v27 }
 0x145   :  { %2254 = vmatpush.bf16.msra.mxu3 %v3798_v11 }
 0x147   :  { %2266 = vmatpush.bf16.msrb.mxu1 %v3807_v14 }
 0x149   :  { %v1566_v33 = vpop.f32.mrf.mxu3  ;;  %v1592_v17 = vpop.f32.mrf.mxu0 }
 0x14a   :  { %v1567_v34 = vadd.f32 %v1566_v33, %v1554_v32 }
 0x14b   :  { %v1555_v38 = vpop.f32.mrf.mxu1  ;;  %2267 = vmatpush.bf16.msrb.mxu1 %v3806_v16 }
 0x14c   :  { %v3816_v38 = vld [vmem:[%s5643_s7 + $0x10] sm:$0xff] }
 0x14e   :  { %v1579_v39 = vpop.f32.mrf.mxu2 }
 0x14f   :  { %v1580_v51 = vadd.f32 %v1579_v39, %v1567_v34  ;;  %v3817_v34 = vld [vmem:[%s5643_s7 + $0x18] sm:$0xff]  ;;  %v3815_v39 = vld [vmem:[%s5643_s7 + $0x8] sm:$0xff] }
 0x150   :  { %2347 = vmatpush.bf16.msrb.mxu2 %v3817_v34 }
 0x151   :  { %v1568_v40 = vpop.f32.mrf.mxu3  ;;  %v1594_v42 = vpop.f32.mrf.mxu0  ;;  %v1593_v57 = vadd.f32 %v1592_v17, %v1580_v51  ;;  %v3814_v51 = vld [vmem:[%s5643_s7] sm:$0xff] }
 0x152   :  { %v3824_v42 = vld [vmem:[%s5640_s6] ss:$0 sm:$0xff] }
 0x153   :  { %v1605_v28 = vpop.f32.mrf.mxu1 }
 0x154   :  { %v1606_v43 = vadd.f32 %v1605_v28, %v1593_v57  ;;  %2348 = vmatpush.bf16.msrb.mxu2 %v3816_v38 }
 0x156   :  { %v1581_v44 = vpop.f32.mrf.mxu2  ;;  %v1612_v46 = vmax.f32 %v1606_v43, 0.0 }
 0x158   :  { %v1616_v30 = vpack.c.bf16 %v1612_v46, %v1612_v46  ;;  %2349 = vmatpush.bf16.msrb.mxu2 %v3815_v39 }
 0x15a   :  { %2054 = vmatmul.bf16.vlgmr.msra.gmra.mxu0 %v1616_v30 }
 0x15b   :  { %v1607_v47 = vpop.f32.mrf.mxu1 }
 0x15c   :  { %2350 = vmatpush.bf16.msrb.mxu2 %v3814_v51 }
 0x169   :  { %v2016_v48 = vpop.f32.mrf.mxu3 }
 0x16a   :  { %2106 = vmatmul.bf16.vlgmr.msrb.gmra.mxu0 %v1616_v30  ;;  %v2017_v52 = vadd.f32 %v2016_v48, %v1683_v50  ;;  %v16_v48 = vstv %s5645_s10  ;;  %v3825_v50 = vld [vmem:[%s5644_s8] ss:$0 sm:$0xff] }
 0x16b   :  { %17 = vst [vmem:[#allocation2] sm:$0x1] %v16_v48 }
 0x171   :  { %v2018_v49 = vpop.f32.mrf.mxu3 }
 0x172   :  { %v3830_v49 = vmov 0   ;;  %v2359_v36 = vld [vmem:[#allocation2] sm:$0x1] }
 0x173   :  { %3823 = vset.pattern.permute.xlu0 %v3830_v49 }
 0x174   :  { %v2029_v54 = vpop.f32.mrf.mxu1  ;;  %2362 = vperm.xlu0 %3823, %v2359_v36  }
 0x175   :  { %v2030_v56 = vadd.f32 %v2029_v54, %v2017_v52 }
 0x17c   :  { %v2031_v58 = vpop.f32.mrf.mxu1 }
 0x185   :  { %v2081_v61 = vpop.f32.mrf.mxu1 }
 0x189   :  { %v2068_v35 = vpop.f32.mrf.mxu3 }
 0x18a   :  { %v2069_v37 = vadd.f32 %v2068_v35, %v1684_v59 }
 0x18c   :  { %v2082_v62 = vadd.f32 %v2081_v61, %v2069_v37 }
 0x18d   :  { %v2083_v41 = vpop.f32.mrf.mxu1 }
 0x191   :  { %v2070_v60 = vpop.f32.mrf.mxu3 }
 0x192   :  { %v2358_v60 = vld [vmem:[%s5646_s9] sm:$0x1] }
 0x1b5   :  { %v2042_v10 = vpop.f32.mrf.mxu2 }
 0x1b6   :  { %v2043_v21 = vadd.f32 %v2042_v10, %v2030_v56 }
 0x1bd   :  { %v2044_v13 = vpop.f32.mrf.mxu2 }
 0x1c5   :  { %v2094_v15 = vpop.f32.mrf.mxu2 }
 0x1c6   :  { %v2095_v29 = vadd.f32 %v2094_v15, %v2082_v62 }
 0x1cd   :  { %v2096_v18 = vpop.f32.mrf.mxu2 }
 0x1d7   :  { %v2055_v22 = vpop.f32.mrf.mxu0 }
 0x1d8   :  { %v2056_v23 = vadd.f32 %v2055_v22, %v2043_v21 }
 0x1da   :  { %v2111_v25 = vmax.f32 %v2056_v23, 0.0 }
 0x1dc   :  { %v2113_v26 = vpack.c.bf16 %v2111_v25, %v2111_v25 }
 0x1de   :  { %2255 = vmatmul.bf16.vlgmr.msra.gmra.mxu3 %v2113_v26 }
 0x1df   :  { %v2057_v27 = vpop.f32.mrf.mxu0 }
 0x1e6   :  { %v2363_v37 = vpop.permute.xlu0 %2362 }
 0x1e7   :  { %v2107_v53 = vpop.f32.mrf.mxu0  ;;  %v2365_v61 = vperm.slane %v2363_v37, 0 }
 0x1e8   :  { %v2108_v31 = vadd.f32 %v2107_v53, %v2095_v29 }
 0x1ea   :  { %v2112_v32 = vmax.f32 %v2108_v31, 0.0 }
 0x1ec   :  { %v2114_v33 = vpack.c.bf16 %v2112_v32, %v2112_v32 }
 0x1ee   :  { %2268 = vmatmul.bf16.vlgmr.msrb.gmra.mxu1 %v2114_v33 }
 0x1ef   :  { %v2109_v17 = vpop.f32.mrf.mxu0 }
 0x261   :  { %v2256_v40 = vpop.f32.mrf.mxu3 }
 0x262   :  { %v2257_v28 = vadd.f32 %v3824_v42, %v2256_v40 }
 0x269   :  { %v2258_v57 = vpop.f32.mrf.mxu3 }
 0x26b   :  { %v2269_v43 = vpop.f32.mrf.mxu1 }
 0x26c   :  { %v2270_v44 = vadd.f32 %v2269_v43, %v2257_v28 }
 0x26e   :  { %v2273_v46 = vmax.f32 %v2270_v44, 0.0 }
 0x270   :  { %v2274_v30 = vpack.c.bf16 %v2273_v46, %v2273_v46 }
 0x272   :  { %2351 = vmatmul.bf16.vlgmr.msrb.gmra.mxu2 %v2274_v30 }
 0x273   :  { %v2271_v47 = vpop.f32.mrf.mxu1 }
 0x2f5   :  { %v2352_v52 = vpop.f32.mrf.mxu2 }
 0x2f6   :  { %v2353_v54 = vadd.f32 %v3825_v50, %v2352_v52 }
 0x2f8   :  { %v2356_v56 = vmax.f32 %v2353_v54, 0.0 }
 0x2fa   :  { %v2357_v35 = vpack.c.bf16 %v2356_v56, %v2356_v56 }
 0x2fc   :  { %v2371_v58 = vsel %vm2366_vm1, %v2357_v35, 0 }
 0x2fd   :  { %v2354_v59 = vpop.f32.mrf.mxu2  ;;  %2380 = vmatpush.bf16.xpose.msra.mxu0 %v2371_v58 }
 0x304   :  { %3537 = vmatmul.msk.bf16.vlgmr.msra.gmra.mxu0 %vm2366_vm1, %v2358_v60 }
 0x381   :  { %v2382_v62 = vpop.f32.mrf.mxu0 }
 0x382   :  { %v2383_v41 = vadd.f32 %v2382_v62, %v2365_v61 }
 0x384   :  { %v2386_v63 = vsub.f32 0.0, %v2383_v41 }
 0x386   :  { %v2387_v0 = vmul.f32 1.442695, %v2386_v63 }
 0x388   :  { %3826 = vpow2.f32 %v2387_v0 }
 0x389   :  { %v2384_v1 = vpop.f32.mrf.mxu0 }
 0x38e   :  { %v3827_v2 = vpop.eup %3826 }
 0x38f   :  { %v2389_v3 = vadd.f32 1.0, %v3827_v2 }
 0x391   :  { %3828 = vrcp.f32 %v2389_v3 }
 0x397   :  { %v3829_v4 = vpop.eup %3828 }
 0x398   :  { %2392 = vst.msk [vmem:[%s5647_s11] sm:$0x1] %vm2391_vm2, %v3829_v4 }

</bundles_post_ra>
